<compile_context>
chip_gen: v6e
topology: v6e:2x2x1
jax: 0.10.0
libtpu: 0.0.40
codegen_flags: <defaults>
</compile_context>

<pallas_src>
import math

import jax
import jax.numpy as jnp
import numpy as np
from jax import lax
from jax.experimental import pallas as pl
from jax.experimental.pallas import tpu as pltpu

# ---- problem sizes ----
B = 8                      # batch
D = 16                     # input_dim (state dim)
HID = 32                   # hidden_dim (per MLP)
U = 1                      # u_dim
L_J = (D - 1) * D // 2     # strict-upper-triangular length
DD = D * D
HF = 4 * HID               # fused hidden width (H | J | R | G) = 128
EPS = 1e-5                 # LayerNorm eps (PyTorch default)
W3_COLS = 2 * DD + D * U   # fused third-layer output width (J | R | G) = 528
# TODO(synk): MLP depth fixed to 2 (Linear-LN-SiLU x2 + Linear); u_dim fixed to 1.

# ---- slab128 row offsets (all multiples of 8 for clean sublane alignment) ----
R_W1 = 0                   # (D,  HF)  fused first-layer weight
R_W2 = R_W1 + D            # (HF, HF)  fused second-layer weight (block-diagonal)
R_BAVG = R_W2 + HF         # (HF, HF)  per-32-lane-segment block-average matrix
R_VEC = R_BAVG + HF        # (8,  HF)  b1,g1,be1,b2,g2,be2, hw3row, spare
R_HW2T = R_VEC + 8         # (HID,HF)  H w2^T  (cols 0:HID)
R_HW1T = R_HW2T + HID      # (HID,HF)  H w1^T  (cols 0:D)
R_TREP = R_HW1T + HID      # (DD, HF)  lane-replicated column selector for t_col
SLAB_ROWS = R_TREP + DD    # 600


# ------------------------------- the kernel -------------------------------
def _phnn_kernel(xu_ref, slab_ref, w3_ref, prowpcol_ref, rhs_ref, out_ref):
    f32 = jnp.float32

    xu = xu_ref[...]                       # (B, D+U)
    x = xu[:, :D]                          # (B, D)
    u = xu[:, D:D + U]                     # (B, U)

    w1f = slab_ref[R_W1:R_W1 + D, :]       # (D, HF)
    w2f = slab_ref[R_W2:R_W2 + HF, :]      # (HF, HF) block-diagonal
    bavg = slab_ref[R_BAVG:R_BAVG + HF, :]  # (HF, HF) per-segment averaging
    vecs = slab_ref[R_VEC:R_VEC + 8, :]    # (8, HF)
    b1f, g1f, be1f = vecs[0:1, :], vecs[1:2, :], vecs[2:3, :]
    b2f, g2f, be2f = vecs[3:4, :], vecs[4:5, :], vecs[5:6, :]
    hw3row = vecs[6:7, :HID]               # (1, HID)  H third-layer weight (row)
    hw2t = slab_ref[R_HW2T:R_HW2T + HID, :][:, :HID]   # (HID, HID)
    hw1t = slab_ref[R_HW1T:R_HW1T + HID, :][:, :D]     # (HID, D)
    trep = slab_ref[R_TREP:R_TREP + DD, :]             # (DD, HF)

    def mm(a, b):
        return jnp.dot(a, b, preferred_element_type=f32)

    # ---- per-32-lane-segment LayerNorm: E[z], E[z^2] from one stacked matmul ----
    def seg_ln(z, g, be):
        nb = z.shape[0]
        stats = mm(jnp.concatenate([z, z * z], axis=0), bavg)   # (2B, HF)
        mu, ez2 = stats[:nb], stats[nb:]
        var = ez2 - mu * mu
        rstd = lax.rsqrt(var + EPS)
        xhat = (z - mu) * rstd
        return xhat * g + be, xhat, rstd

    # ---- fused forward: layer 1 and layer 2 (all four MLPs at once) ----
    z1 = mm(x, w1f) + b1f                  # (B, HF)
    n1, xhat1, rstd1 = seg_ln(z1, g1f, be1f)
    s1 = jax.nn.sigmoid(n1)                # reused for SiLU and its derivative
    a1 = n1 * s1

    z2 = mm(a1, w2f) + b2f                 # (B, HF)
    n2, xhat2, rstd2 = seg_ln(z2, g2f, be2f)
    s2 = jax.nn.sigmoid(n2)
    a2 = n2 * s2

    # ---- grad_H: analytic backward through the H segment (lanes 0:HID) ----
    def seg_ln_bwd(dn, xhat, rstd, g):
        dxh = dn * g
        m1 = jnp.mean(dxh, axis=-1, keepdims=True)
        m2 = jnp.mean(dxh * xhat, axis=-1, keepdims=True)
        return rstd * (dxh - m1 - xhat * m2)

    n2h, s2h = n2[:, :HID], s2[:, :HID]
    dsilu2 = s2h * (1.0 + n2h * (1.0 - s2h))
    dn2 = hw3row * dsilu2                                     # dH/dn2
    dz2 = seg_ln_bwd(dn2, xhat2[:, :HID], rstd2[:, :HID], g2f[:, :HID])
    da1 = mm(dz2, hw2t)                                       # (B, HID)
    n1h, s1h = n1[:, :HID], s1[:, :HID]
    dsilu1 = s1h * (1.0 + n1h * (1.0 - s1h))
    dn1 = da1 * dsilu1
    dz1 = seg_ln_bwd(dn1, xhat1[:, :HID], rstd1[:, :HID], g1f[:, :HID])
    grad_h = mm(dz1, hw1t)                                    # (B, D)

    # ---- fused third layer for J | R | G (svtu folded into J weight on host) ----
    z3 = mm(a2, w3_ref[0:HF, :]) + w3_ref[HF:HF + 1, :]       # (B, W3_COLS)
    mflat = z3[:, :DD]                     # M[b,i,j] = mflat[b, i*D+j]
    rvec = z3[:, DD:2 * DD]                # R[b,i,j] = rvec[b, i*D+j]
    gvec = z3[:, 2 * DD:2 * DD + D]        # (B, D)  since U == 1

    # ---- gh_row / gh_col from one matmul against [prow | pcol] ----
    gh = mm(grad_h, prowpcol_ref[...])     # (B, 2*DD)
    gh_row = gh[:, :DD]                    # gh_row[b, i*D+j] = grad_h[b, i]
    gh_col = gh[:, DD:]                    # gh_col[b, i*D+j] = grad_h[b, j]

    # ---- t_col = (grad_h @ R) replicated across lanes, in one matmul + aligned concat
    t128 = mm(rvec * gh_row, trep)                       # (B, HF): t[b, m % D]
    t_col = jnp.concatenate([t128, t128], axis=1)        # (B, DD)

    # ---- fused final contraction: j_hat - r_hat in a single matmul ----
    lhs = jnp.concatenate([mflat * gh_row, mflat * gh_col, rvec * t_col], axis=1)
    fused = mm(lhs, rhs_ref[...])                        # (B, D) = j_hat - r_hat

    xdot = fused + gvec * u                              # + input_term (G u)
    y = jnp.sum(gvec * grad_h, axis=-1, keepdims=True)   # (B, U)  G^T grad_h

    out_ref[:, :D] = xdot
    out_ref[:, D:D + U] = y


# ------------------------------- wrapper -------------------------------
def phnn_forward(x, u, packed):
    slab, w3slab, prowpcol, finrhs = packed
    xu = jnp.concatenate([x, u], axis=1)                      # (B, D+U)
    vmem = pl.BlockSpec(memory_space=pltpu.MemorySpace.VMEM)
    out = pl.pallas_call(
        _phnn_kernel,
        out_shape=jax.ShapeDtypeStruct((x.shape[0], D + U), jnp.float32),
        in_specs=[vmem] * 5,
        out_specs=vmem,
    )(xu, slab, w3slab, prowpcol, finrhs)
    return out[:, :D], out[:, D:D + U]


# ------------------------ host-side parameter packing ------------------------
def pack_params(hp, jp, rp, gp, svtu_np):
    f = np.float32
    mlps = (hp, jp, rp, gp)                # segment order: H | J | R | G

    # --- slab128: everything that is naturally 128 lanes wide ---
    slab = np.zeros((SLAB_ROWS, HF), f)
    slab[R_W1:R_W1 + D, :] = np.concatenate(
        [np.asarray(p['w1']) for p in mlps], axis=1)               # (D, HF)
    for s, p in enumerate(mlps):
        slab[R_W2 + s * HID:R_W2 + (s + 1) * HID,
             s * HID:(s + 1) * HID] = np.asarray(p['w2'])          # block-diag w2
        slab[R_BAVG + s * HID:R_BAVG + (s + 1) * HID,
             s * HID:(s + 1) * HID] = 1.0 / HID                    # block-average

    def cat(key):
        return np.concatenate([np.asarray(p[key]) for p in mlps], axis=1)[0]

    for r, key in enumerate(('b1', 'g1', 'be1', 'b2', 'g2', 'be2')):
        slab[R_VEC + r, :] = cat(key)
    slab[R_VEC + 6, :HID] = np.asarray(hp['w3'])[:, 0]             # H w3 as a row
    slab[R_HW2T:R_HW2T + HID, :HID] = np.asarray(hp['w2']).T
    slab[R_HW1T:R_HW1T + HID, :D] = np.asarray(hp['w1']).T
    kk = np.arange(DD)[:, None]
    mm_ = np.arange(HF)[None, :]
    slab[R_TREP:R_TREP + DD, :] = ((kk % D) == (mm_ % D)).astype(f)  # trep

    # --- fused third-layer weights + bias row (rows 0:HID are the unused H segment) ---
    w3slab = np.zeros((HF + 1, W3_COLS), f)
    w3slab[HID:2 * HID, :DD] = np.asarray(jp['w3']) @ svtu_np        # jw3 @ svtu
    w3slab[2 * HID:3 * HID, DD:2 * DD] = np.asarray(rp['w3'])
    w3slab[3 * HID:4 * HID, 2 * DD:] = np.asarray(gp['w3'])
    w3slab[HF, :DD] = (np.asarray(jp['b3']) @ svtu_np)[0]
    w3slab[HF, DD:2 * DD] = np.asarray(rp['b3'])[0]
    w3slab[HF, 2 * DD:] = np.asarray(gp['b3'])[0]

    # --- row/col one-hot selectors ---
    prow = np.zeros((D, DD), f)
    pcol = np.zeros((D, DD), f)
    for i in range(D):
        for j in range(D):
            prow[i, i * D + j] = 1.0       # gh_row = grad_h @ prow
            pcol[j, i * D + j] = 1.0       # gh_col = grad_h @ pcol
    prowpcol = np.concatenate([prow, pcol], axis=1)                  # (D, 2*DD)

    # --- fused final-contraction RHS: [pcol_t ; -prow_t ; -prow_t/sqrt(D)] ---
    finrhs = np.zeros((3 * DD, D), f)
    finrhs[:DD, :] = pcol.T
    finrhs[DD:2 * DD, :] = -prow.T
    finrhs[2 * DD:, :] = -prow.T / math.sqrt(D)

    return (jnp.asarray(slab), jnp.asarray(w3slab),
            jnp.asarray(prowpcol), jnp.asarray(finrhs))


# ---------------------- deterministic parameter init ----------------------
def init_mlp(key, d_in, d_hid, d_out):
    ks = jax.random.split(key, 6)
    return dict(
        w1=jax.random.normal(ks[0], (d_in, d_hid), jnp.float32) / np.sqrt(d_in),
        b1=jax.random.normal(ks[1], (1, d_hid), jnp.float32) * 0.1,
        g1=jnp.ones((1, d_hid), jnp.float32),
        be1=jnp.zeros((1, d_hid), jnp.float32),
        w2=jax.random.normal(ks[2], (d_hid, d_hid), jnp.float32) / np.sqrt(d_hid),
        b2=jax.random.normal(ks[3], (1, d_hid), jnp.float32) * 0.1,
        g2=jnp.ones((1, d_hid), jnp.float32),
        be2=jnp.zeros((1, d_hid), jnp.float32),
        w3=jax.random.normal(ks[4], (d_hid, d_out), jnp.float32) / np.sqrt(d_hid),
        b3=jax.random.normal(ks[5], (1, d_out), jnp.float32) * 0.1,
    )


# ---------------------------- pure-JAX reference ----------------------------
def _silu(x):
    return x * jax.nn.sigmoid(x)


def _layernorm_ref(z, g, b):
    mu = jnp.mean(z, -1, keepdims=True)
    var = jnp.mean((z - mu) ** 2, -1, keepdims=True)
    return (z - mu) * jax.lax.rsqrt(var + EPS) * g + b


def _mlp_ref(p, x):
    h = _silu(_layernorm_ref(x @ p['w1'] + p['b1'], p['g1'], p['be1']))
    h = _silu(_layernorm_ref(h @ p['w2'] + p['b2'], p['g2'], p['be2']))
    return h @ p['w3'] + p['b3']


def phnn_reference(x, u, hp, jp, rp, gp, svtu_np):
    grad_h = jax.grad(lambda xx: jnp.sum(_mlp_ref(hp, xx)))(x)
    jvec = _mlp_ref(jp, x)
    M = (jvec @ jnp.asarray(svtu_np)).reshape(-1, D, D)
    J = M - jnp.transpose(M, (0, 2, 1))
    j_hat = jnp.einsum('bd,bde->be', grad_h, J)
    rvec = _mlp_ref(rp, x)
    R = rvec.reshape(-1, D, D)
    r_hat = jnp.einsum('bd,bde,bfe->bf', grad_h, R, R) / math.sqrt(D)
    gvec = _mlp_ref(gp, x)
    G = gvec.reshape(-1, D, U)
    y = jnp.einsum('bdu,bd->bu', G, grad_h)
    input_term = jnp.einsum('bdu,bu->bd', G, u)
    return j_hat - r_hat + input_term, y


# --------------------------------- main ---------------------------------
if __name__ == "__main__":
    key = jax.random.PRNGKey(0)
    k_x, k_u, k_h, k_j, k_r, k_g = jax.random.split(key, 6)

    x = jax.random.normal(k_x, (B, D), jnp.float32)
    u = jax.random.normal(k_u, (B, U), jnp.float32)

    hp = init_mlp(k_h, D, HID, 1)
    jp = init_mlp(k_j, D, HID, L_J)
    rp = init_mlp(k_r, D, HID, D * D)
    gp = init_mlp(k_g, D, HID, D * U)

    # VTU (strict=True) scatter matrix, used only on the host for the svtu fold
    # and by the reference.
    idx = [j * D + i for j in range(D) for i in range(j + 1, D)]
    svtu_np = np.zeros((L_J, DD), np.float32)
    svtu_np[np.arange(L_J), np.array(idx)] = 1.0

    packed = jax.block_until_ready(pack_params(hp, jp, rp, gp, svtu_np))

    xdot, y = jax.block_until_ready(phnn_forward(x, u, packed))

    with jax.default_matmul_precision("float32"):
        xdot_ref, y_ref = phnn_reference(x, u, hp, jp, rp, gp, svtu_np)
    xdot_ref, y_ref = jax.block_until_ready((xdot_ref, y_ref))

    assert np.allclose(np.asarray(xdot), np.asarray(xdot_ref), rtol=1e-2, atol=1e-2)
    assert np.allclose(np.asarray(y), np.asarray(y_ref), rtol=1e-2, atol=1e-2)
    print("KERNEL_OK")
</pallas_src>

<mosaic_0001>
module attributes {stable_mosaic.version = 11 : i64} {
  func.func @_phnn_kernel(%arg0: memref<8x17xf32, #tpu.memory_space<vmem>>, %arg1: memref<600x128xf32, #tpu.memory_space<vmem>>, %arg2: memref<129x528xf32, #tpu.memory_space<vmem>>, %arg3: memref<16x512xf32, #tpu.memory_space<vmem>>, %arg4: memref<768x16xf32, #tpu.memory_space<vmem>>, %arg5: memref<8x17xf32, #tpu.memory_space<vmem>>) attributes {dimension_semantics = [], scalar_prefetch = 0 : i64, scratch_operands = 0 : i64, tpu.core_type = #tpu.core_type<tc>} {
    %c0 = arith.constant 0 : index
    %c0_0 = arith.constant 0 : index
    %0 = vector.load %arg0[%c0, %c0_0] : memref<8x17xf32, #tpu.memory_space<vmem>>, vector<8x17xf32>
    %1 = vector.extract_strided_slice %0 {offsets = [0, 0], sizes = [8, 16], strides = [1, 1]} : vector<8x17xf32> to vector<8x16xf32>
    %2 = vector.extract_strided_slice %0 {offsets = [0, 16], sizes = [8, 1], strides = [1, 1]} : vector<8x17xf32> to vector<8x1xf32>
    %c0_1 = arith.constant 0 : index
    %c0_2 = arith.constant 0 : index
    %3 = vector.load %arg1[%c0_1, %c0_2] : memref<600x128xf32, #tpu.memory_space<vmem>>, vector<16x128xf32>
    %c16 = arith.constant 16 : index
    %c0_3 = arith.constant 0 : index
    %4 = vector.load %arg1[%c16, %c0_3] : memref<600x128xf32, #tpu.memory_space<vmem>>, vector<128x128xf32>
    %c144 = arith.constant 144 : index
    %c0_4 = arith.constant 0 : index
    %5 = vector.load %arg1[%c144, %c0_4] : memref<600x128xf32, #tpu.memory_space<vmem>>, vector<128x128xf32>
    %c272 = arith.constant 272 : index
    %c0_5 = arith.constant 0 : index
    %6 = vector.load %arg1[%c272, %c0_5] : memref<600x128xf32, #tpu.memory_space<vmem>>, vector<8x128xf32>
    %7 = vector.extract_strided_slice %6 {offsets = [0, 0], sizes = [1, 128], strides = [1, 1]} : vector<8x128xf32> to vector<1x128xf32>
    %8 = vector.extract_strided_slice %6 {offsets = [1, 0], sizes = [1, 128], strides = [1, 1]} : vector<8x128xf32> to vector<1x128xf32>
    %9 = vector.extract_strided_slice %6 {offsets = [2, 0], sizes = [1, 128], strides = [1, 1]} : vector<8x128xf32> to vector<1x128xf32>
    %10 = vector.extract_strided_slice %6 {offsets = [3, 0], sizes = [1, 128], strides = [1, 1]} : vector<8x128xf32> to vector<1x128xf32>
    %11 = vector.extract_strided_slice %6 {offsets = [4, 0], sizes = [1, 128], strides = [1, 1]} : vector<8x128xf32> to vector<1x128xf32>
    %12 = vector.extract_strided_slice %6 {offsets = [5, 0], sizes = [1, 128], strides = [1, 1]} : vector<8x128xf32> to vector<1x128xf32>
    %13 = vector.extract_strided_slice %6 {offsets = [6, 0], sizes = [1, 32], strides = [1, 1]} : vector<8x128xf32> to vector<1x32xf32>
    %c280 = arith.constant 280 : index
    %c0_6 = arith.constant 0 : index
    %14 = vector.load %arg1[%c280, %c0_6] : memref<600x128xf32, #tpu.memory_space<vmem>>, vector<32x128xf32>
    %15 = vector.extract_strided_slice %14 {offsets = [0, 0], sizes = [32, 32], strides = [1, 1]} : vector<32x128xf32> to vector<32x32xf32>
    %c312 = arith.constant 312 : index
    %c0_7 = arith.constant 0 : index
    %16 = vector.load %arg1[%c312, %c0_7] : memref<600x128xf32, #tpu.memory_space<vmem>>, vector<32x128xf32>
    %17 = vector.extract_strided_slice %16 {offsets = [0, 0], sizes = [32, 16], strides = [1, 1]} : vector<32x128xf32> to vector<32x16xf32>
    %c344 = arith.constant 344 : index
    %c0_8 = arith.constant 0 : index
    %18 = vector.load %arg1[%c344, %c0_8] : memref<600x128xf32, #tpu.memory_space<vmem>>, vector<256x128xf32>
    %cst = arith.constant dense<0.000000e+00> : vector<8x128xf32>
    %19 = tpu.matmul %1, %3, %cst {dimension_numbers = #tpu.dot_dimension_numbers<[1], [0], [0], [1], [0, 0, 1, 1], [], []>} : vector<8x16xf32>, vector<16x128xf32>, vector<8x128xf32> -> vector<8x128xf32>
    %20 = vector.broadcast %7 : vector<1x128xf32> to vector<8x128xf32>
    %21 = arith.addf %19, %20 : vector<8x128xf32>
    %22 = arith.mulf %21, %21 : vector<8x128xf32>
    %23 = tpu.concatenate %21, %22 in 0 : vector<8x128xf32>, vector<8x128xf32> -> vector<16x128xf32>
    %cst_9 = arith.constant dense<0.000000e+00> : vector<16x128xf32>
    %24 = tpu.matmul %23, %5, %cst_9 {dimension_numbers = #tpu.dot_dimension_numbers<[1], [0], [0], [1], [0, 0, 1, 1], [], []>} : vector<16x128xf32>, vector<128x128xf32>, vector<16x128xf32> -> vector<16x128xf32>
    %25 = vector.extract_strided_slice %24 {offsets = [0, 0], sizes = [8, 128], strides = [1, 1]} : vector<16x128xf32> to vector<8x128xf32>
    %26 = vector.extract_strided_slice %24 {offsets = [8, 0], sizes = [8, 128], strides = [1, 1]} : vector<16x128xf32> to vector<8x128xf32>
    %27 = arith.mulf %25, %25 : vector<8x128xf32>
    %28 = arith.subf %26, %27 : vector<8x128xf32>
    %cst_10 = arith.constant 9.99999974E-6 : f32
    %29 = vector.broadcast %cst_10 : f32 to vector<8x128xf32>
    %30 = arith.addf %28, %29 : vector<8x128xf32>
    %31 = math.rsqrt %30 : vector<8x128xf32>
    %32 = arith.subf %21, %25 : vector<8x128xf32>
    %33 = arith.mulf %32, %31 : vector<8x128xf32>
    %34 = vector.broadcast %8 : vector<1x128xf32> to vector<8x128xf32>
    %35 = arith.mulf %33, %34 : vector<8x128xf32>
    %36 = vector.broadcast %9 : vector<1x128xf32> to vector<8x128xf32>
    %37 = arith.addf %35, %36 : vector<8x128xf32>
    %38 = arith.negf %37 : vector<8x128xf32>
    %39 = math.exp %38 : vector<8x128xf32>
    %cst_11 = arith.constant 1.000000e+00 : f32
    %40 = vector.broadcast %cst_11 : f32 to vector<8x128xf32>
    %41 = arith.addf %40, %39 : vector<8x128xf32>
    %42 = arith.divf %40, %41 : vector<8x128xf32>
    %43 = arith.mulf %37, %42 : vector<8x128xf32>
    %cst_12 = arith.constant dense<0.000000e+00> : vector<8x128xf32>
    %44 = tpu.matmul %43, %4, %cst_12 {dimension_numbers = #tpu.dot_dimension_numbers<[1], [0], [0], [1], [0, 0, 1, 1], [], []>} : vector<8x128xf32>, vector<128x128xf32>, vector<8x128xf32> -> vector<8x128xf32>
    %45 = vector.broadcast %10 : vector<1x128xf32> to vector<8x128xf32>
    %46 = arith.addf %44, %45 : vector<8x128xf32>
    %47 = arith.mulf %46, %46 : vector<8x128xf32>
    %48 = tpu.concatenate %46, %47 in 0 : vector<8x128xf32>, vector<8x128xf32> -> vector<16x128xf32>
    %cst_13 = arith.constant dense<0.000000e+00> : vector<16x128xf32>
    %49 = tpu.matmul %48, %5, %cst_13 {dimension_numbers = #tpu.dot_dimension_numbers<[1], [0], [0], [1], [0, 0, 1, 1], [], []>} : vector<16x128xf32>, vector<128x128xf32>, vector<16x128xf32> -> vector<16x128xf32>
    %50 = vector.extract_strided_slice %49 {offsets = [0, 0], sizes = [8, 128], strides = [1, 1]} : vector<16x128xf32> to vector<8x128xf32>
    %51 = vector.extract_strided_slice %49 {offsets = [8, 0], sizes = [8, 128], strides = [1, 1]} : vector<16x128xf32> to vector<8x128xf32>
    %52 = arith.mulf %50, %50 : vector<8x128xf32>
    %53 = arith.subf %51, %52 : vector<8x128xf32>
    %cst_14 = arith.constant 9.99999974E-6 : f32
    %54 = vector.broadcast %cst_14 : f32 to vector<8x128xf32>
    %55 = arith.addf %53, %54 : vector<8x128xf32>
    %56 = math.rsqrt %55 : vector<8x128xf32>
    %57 = arith.subf %46, %50 : vector<8x128xf32>
    %58 = arith.mulf %57, %56 : vector<8x128xf32>
    %59 = vector.broadcast %11 : vector<1x128xf32> to vector<8x128xf32>
    %60 = arith.mulf %58, %59 : vector<8x128xf32>
    %61 = vector.broadcast %12 : vector<1x128xf32> to vector<8x128xf32>
    %62 = arith.addf %60, %61 : vector<8x128xf32>
    %63 = arith.negf %62 : vector<8x128xf32>
    %64 = math.exp %63 : vector<8x128xf32>
    %cst_15 = arith.constant 1.000000e+00 : f32
    %65 = vector.broadcast %cst_15 : f32 to vector<8x128xf32>
    %66 = arith.addf %65, %64 : vector<8x128xf32>
    %67 = arith.divf %65, %66 : vector<8x128xf32>
    %68 = arith.mulf %62, %67 : vector<8x128xf32>
    %69 = vector.extract_strided_slice %62 {offsets = [0, 0], sizes = [8, 32], strides = [1, 1]} : vector<8x128xf32> to vector<8x32xf32>
    %70 = vector.extract_strided_slice %67 {offsets = [0, 0], sizes = [8, 32], strides = [1, 1]} : vector<8x128xf32> to vector<8x32xf32>
    %cst_16 = arith.constant 1.000000e+00 : f32
    %71 = vector.broadcast %cst_16 : f32 to vector<8x32xf32>
    %72 = arith.subf %71, %70 : vector<8x32xf32>
    %73 = arith.mulf %69, %72 : vector<8x32xf32>
    %cst_17 = arith.constant 1.000000e+00 : f32
    %74 = vector.broadcast %cst_17 : f32 to vector<8x32xf32>
    %75 = arith.addf %74, %73 : vector<8x32xf32>
    %76 = arith.mulf %70, %75 : vector<8x32xf32>
    %77 = vector.broadcast %13 : vector<1x32xf32> to vector<8x32xf32>
    %78 = arith.mulf %77, %76 : vector<8x32xf32>
    %79 = vector.extract_strided_slice %58 {offsets = [0, 0], sizes = [8, 32], strides = [1, 1]} : vector<8x128xf32> to vector<8x32xf32>
    %80 = vector.extract_strided_slice %56 {offsets = [0, 0], sizes = [8, 32], strides = [1, 1]} : vector<8x128xf32> to vector<8x32xf32>
    %81 = vector.extract_strided_slice %11 {offsets = [0, 0], sizes = [1, 32], strides = [1, 1]} : vector<1x128xf32> to vector<1x32xf32>
    %82 = vector.broadcast %81 : vector<1x32xf32> to vector<8x32xf32>
    %83 = arith.mulf %78, %82 : vector<8x32xf32>
    %cst_18 = arith.constant dense<0.000000e+00> : vector<8xf32>
    %84 = vector.multi_reduction <add>, %83, %cst_18 [1] : vector<8x32xf32> to vector<8xf32>
    %85 = vector.shape_cast %84 : vector<8xf32> to vector<8x1xf32>
    %cst_19 = arith.constant 3.200000e+01 : f32
    %86 = vector.broadcast %cst_19 : f32 to vector<8x1xf32>
    %87 = arith.divf %85, %86 : vector<8x1xf32>
    %88 = arith.mulf %83, %79 : vector<8x32xf32>
    %cst_20 = arith.constant dense<0.000000e+00> : vector<8xf32>
    %89 = vector.multi_reduction <add>, %88, %cst_20 [1] : vector<8x32xf32> to vector<8xf32>
    %90 = vector.shape_cast %89 : vector<8xf32> to vector<8x1xf32>
    %cst_21 = arith.constant 3.200000e+01 : f32
    %91 = vector.broadcast %cst_21 : f32 to vector<8x1xf32>
    %92 = arith.divf %90, %91 : vector<8x1xf32>
    %93 = vector.broadcast %87 : vector<8x1xf32> to vector<8x32xf32>
    %94 = arith.subf %83, %93 : vector<8x32xf32>
    %95 = vector.broadcast %92 : vector<8x1xf32> to vector<8x32xf32>
    %96 = arith.mulf %79, %95 : vector<8x32xf32>
    %97 = arith.subf %94, %96 : vector<8x32xf32>
    %98 = arith.mulf %80, %97 : vector<8x32xf32>
    %cst_22 = arith.constant dense<0.000000e+00> : vector<8x32xf32>
    %99 = tpu.matmul %98, %15, %cst_22 {dimension_numbers = #tpu.dot_dimension_numbers<[1], [0], [0], [1], [0, 0, 1, 1], [], []>} : vector<8x32xf32>, vector<32x32xf32>, vector<8x32xf32> -> vector<8x32xf32>
    %100 = vector.extract_strided_slice %37 {offsets = [0, 0], sizes = [8, 32], strides = [1, 1]} : vector<8x128xf32> to vector<8x32xf32>
    %101 = vector.extract_strided_slice %42 {offsets = [0, 0], sizes = [8, 32], strides = [1, 1]} : vector<8x128xf32> to vector<8x32xf32>
    %cst_23 = arith.constant 1.000000e+00 : f32
    %102 = vector.broadcast %cst_23 : f32 to vector<8x32xf32>
    %103 = arith.subf %102, %101 : vector<8x32xf32>
    %104 = arith.mulf %100, %103 : vector<8x32xf32>
    %cst_24 = arith.constant 1.000000e+00 : f32
    %105 = vector.broadcast %cst_24 : f32 to vector<8x32xf32>
    %106 = arith.addf %105, %104 : vector<8x32xf32>
    %107 = arith.mulf %101, %106 : vector<8x32xf32>
    %108 = arith.mulf %99, %107 : vector<8x32xf32>
    %109 = vector.extract_strided_slice %33 {offsets = [0, 0], sizes = [8, 32], strides = [1, 1]} : vector<8x128xf32> to vector<8x32xf32>
    %110 = vector.extract_strided_slice %31 {offsets = [0, 0], sizes = [8, 32], strides = [1, 1]} : vector<8x128xf32> to vector<8x32xf32>
    %111 = vector.extract_strided_slice %8 {offsets = [0, 0], sizes = [1, 32], strides = [1, 1]} : vector<1x128xf32> to vector<1x32xf32>
    %112 = vector.broadcast %111 : vector<1x32xf32> to vector<8x32xf32>
    %113 = arith.mulf %108, %112 : vector<8x32xf32>
    %cst_25 = arith.constant dense<0.000000e+00> : vector<8xf32>
    %114 = vector.multi_reduction <add>, %113, %cst_25 [1] : vector<8x32xf32> to vector<8xf32>
    %115 = vector.shape_cast %114 : vector<8xf32> to vector<8x1xf32>
    %cst_26 = arith.constant 3.200000e+01 : f32
    %116 = vector.broadcast %cst_26 : f32 to vector<8x1xf32>
    %117 = arith.divf %115, %116 : vector<8x1xf32>
    %118 = arith.mulf %113, %109 : vector<8x32xf32>
    %cst_27 = arith.constant dense<0.000000e+00> : vector<8xf32>
    %119 = vector.multi_reduction <add>, %118, %cst_27 [1] : vector<8x32xf32> to vector<8xf32>
    %120 = vector.shape_cast %119 : vector<8xf32> to vector<8x1xf32>
    %cst_28 = arith.constant 3.200000e+01 : f32
    %121 = vector.broadcast %cst_28 : f32 to vector<8x1xf32>
    %122 = arith.divf %120, %121 : vector<8x1xf32>
    %123 = vector.broadcast %117 : vector<8x1xf32> to vector<8x32xf32>
    %124 = arith.subf %113, %123 : vector<8x32xf32>
    %125 = vector.broadcast %122 : vector<8x1xf32> to vector<8x32xf32>
    %126 = arith.mulf %109, %125 : vector<8x32xf32>
    %127 = arith.subf %124, %126 : vector<8x32xf32>
    %128 = arith.mulf %110, %127 : vector<8x32xf32>
    %cst_29 = arith.constant dense<0.000000e+00> : vector<8x16xf32>
    %129 = tpu.matmul %128, %17, %cst_29 {dimension_numbers = #tpu.dot_dimension_numbers<[1], [0], [0], [1], [0, 0, 1, 1], [], []>} : vector<8x32xf32>, vector<32x16xf32>, vector<8x16xf32> -> vector<8x16xf32>
    %c0_30 = arith.constant 0 : index
    %c0_31 = arith.constant 0 : index
    %130 = vector.load %arg2[%c0_30, %c0_31] : memref<129x528xf32, #tpu.memory_space<vmem>>, vector<128x528xf32>
    %cst_32 = arith.constant dense<0.000000e+00> : vector<8x528xf32>
    %131 = tpu.matmul %68, %130, %cst_32 {dimension_numbers = #tpu.dot_dimension_numbers<[1], [0], [0], [1], [0, 0, 1, 1], [], []>} : vector<8x128xf32>, vector<128x528xf32>, vector<8x528xf32> -> vector<8x528xf32>
    %c128 = arith.constant 128 : index
    %c0_33 = arith.constant 0 : index
    %132 = vector.load %arg2[%c128, %c0_33] : memref<129x528xf32, #tpu.memory_space<vmem>>, vector<1x528xf32>
    %133 = vector.broadcast %132 : vector<1x528xf32> to vector<8x528xf32>
    %134 = arith.addf %131, %133 : vector<8x528xf32>
    %135 = vector.extract_strided_slice %134 {offsets = [0, 0], sizes = [8, 256], strides = [1, 1]} : vector<8x528xf32> to vector<8x256xf32>
    %136 = vector.extract_strided_slice %134 {offsets = [0, 256], sizes = [8, 256], strides = [1, 1]} : vector<8x528xf32> to vector<8x256xf32>
    %137 = vector.extract_strided_slice %134 {offsets = [0, 512], sizes = [8, 16], strides = [1, 1]} : vector<8x528xf32> to vector<8x16xf32>
    %c0_34 = arith.constant 0 : index
    %c0_35 = arith.constant 0 : index
    %138 = vector.load %arg3[%c0_34, %c0_35] : memref<16x512xf32, #tpu.memory_space<vmem>>, vector<16x512xf32>
    %cst_36 = arith.constant dense<0.000000e+00> : vector<8x512xf32>
    %139 = tpu.matmul %129, %138, %cst_36 {dimension_numbers = #tpu.dot_dimension_numbers<[1], [0], [0], [1], [0, 0, 1, 1], [], []>} : vector<8x16xf32>, vector<16x512xf32>, vector<8x512xf32> -> vector<8x512xf32>
    %140 = vector.extract_strided_slice %139 {offsets = [0, 0], sizes = [8, 256], strides = [1, 1]} : vector<8x512xf32> to vector<8x256xf32>
    %141 = vector.extract_strided_slice %139 {offsets = [0, 256], sizes = [8, 256], strides = [1, 1]} : vector<8x512xf32> to vector<8x256xf32>
    %142 = arith.mulf %136, %140 : vector<8x256xf32>
    %cst_37 = arith.constant dense<0.000000e+00> : vector<8x128xf32>
    %143 = tpu.matmul %142, %18, %cst_37 {dimension_numbers = #tpu.dot_dimension_numbers<[1], [0], [0], [1], [0, 0, 1, 1], [], []>} : vector<8x256xf32>, vector<256x128xf32>, vector<8x128xf32> -> vector<8x128xf32>
    %144 = tpu.concatenate %143, %143 in 1 : vector<8x128xf32>, vector<8x128xf32> -> vector<8x256xf32>
    %145 = arith.mulf %135, %140 : vector<8x256xf32>
    %146 = arith.mulf %135, %141 : vector<8x256xf32>
    %147 = arith.mulf %136, %144 : vector<8x256xf32>
    %148 = tpu.concatenate %145, %146, %147 in 1 : vector<8x256xf32>, vector<8x256xf32>, vector<8x256xf32> -> vector<8x768xf32>
    %c0_38 = arith.constant 0 : index
    %c0_39 = arith.constant 0 : index
    %149 = vector.load %arg4[%c0_38, %c0_39] : memref<768x16xf32, #tpu.memory_space<vmem>>, vector<768x16xf32>
    %cst_40 = arith.constant dense<0.000000e+00> : vector<8x16xf32>
    %150 = tpu.matmul %148, %149, %cst_40 {dimension_numbers = #tpu.dot_dimension_numbers<[1], [0], [0], [1], [0, 0, 1, 1], [], []>} : vector<8x768xf32>, vector<768x16xf32>, vector<8x16xf32> -> vector<8x16xf32>
    %151 = vector.broadcast %2 : vector<8x1xf32> to vector<8x16xf32>
    %152 = arith.mulf %137, %151 : vector<8x16xf32>
    %153 = arith.addf %150, %152 : vector<8x16xf32>
    %154 = arith.mulf %137, %129 : vector<8x16xf32>
    %cst_41 = arith.constant dense<0.000000e+00> : vector<8xf32>
    %155 = vector.multi_reduction <add>, %154, %cst_41 [1] : vector<8x16xf32> to vector<8xf32>
    %156 = vector.shape_cast %155 : vector<8xf32> to vector<8x1xf32>
    %c0_42 = arith.constant 0 : index
    %c0_43 = arith.constant 0 : index
    %157 = vector.load %arg5[%c0_42, %c0_43] : memref<8x17xf32, #tpu.memory_space<vmem>>, vector<8x16xf32>
    tpu.vector_store %arg5[%c0_42, %c0_43], %153 {strides = array<i32>} : memref<8x17xf32, #tpu.memory_space<vmem>>, vector<8x16xf32>,
    %c0_44 = arith.constant 0 : index
    %c16_45 = arith.constant 16 : index
    %158 = vector.load %arg5[%c0_44, %c16_45] : memref<8x17xf32, #tpu.memory_space<vmem>>, vector<8x1xf32>
    tpu.vector_store %arg5[%c0_44, %c16_45], %156 {strides = array<i32>} : memref<8x17xf32, #tpu.memory_space<vmem>>, vector<8x1xf32>,
    return
  }
}

</mosaic_0001>

<bundles_post_ra>
// kernel: tpu_custom_call.1
= control target key start
LH: loop header
LB: loop body
LE: loop exit
PB: predicated region body
PF: predicated region fallthrough
CT: control target
= control target key end

     0   :  { %10 = vsyncpa [#allocation3], 0  ;;  %s2772_s0 = inlined_call_operand.vmem [shape: f32[8,17], index: 0, kind: input, shape index: {}]   ;;  %s2773_s1 = inlined_call_operand.hbm [shape: f32[600,128], index: 1, kind: input, shape index: {}]   ;;  %s2774_s2 = inlined_call_operand.vmem [shape: f32[129,528], index: 2, kind: input, shape index: {}]   ;;  %s2775_s3 = inlined_call_operand.vmem [shape: f32[16,512], index: 3, kind: input, shape index: {}]   ;;  %s2776_s4 = inlined_call_operand.vmem [shape: f32[768,16], index: 4, kind: input, shape index: {}]   ;;  %s2777_s5 = inlined_call_operand.hbm [shape: f32[8,17], index: 5, kind: output, shape index: {}]  }
   0x1   :  { %11 = vsyncpa [#allocation4], 0  ;;  %s2002_s18 = smov [#allocation2]  }
   0x2   :  { %s19_s19 = sshll.u32 %s2002_s18, 4  ;;  %s20_s19 = int_to_ptr.vmem [resolvable:$true] %s19_s19 }
   0x3   :  { %s1966_s20 = scalar_lea.vmem %s20_s19, 9600  ;;  %p1971_p1 = scmp.lt.s32.totalorder %s20_s19, %s20_s19 }
   0x4   :  { %p1967_p0 = scmp.ne.s32.totalorder %s20_s19, %s1966_s20  ;;  %p1972_p2 = scmp.lt.s32.totalorder %s1966_s20, %s1966_s20 }
   0x6   :  { %p1973_p3 = por %p1972_p2, %p1971_p1 }
   0x8   :  { %p1974_p4 = pnand %p1973_p3, %p1967_p0 }
   0xa   :  { %1977 = shalt.err (!%p1974_p4)
}
   0xb   :  { %s2003_s21 = smov 128   ;;  %s2004_s22 = smov 8  }
   0xc   :  { %25 = dma.hbm_to_vmem [thread:$0]  %s2773_s1, 9600, %s20_s19, [#allocation3], %s2003_s21, %s2003_s21, %s2004_s22  }
   0xd   :  { %1998 = dma.done.wait [#allocation3], 9600  }
   0xe   :  { %1999 = vsyncadd [#allocation3], 4294957696  ;;  %v2005_v0 = vmov 0.0   ;;  %vm2006_vm0 = vmmov 0   ;;  %v37_v1 = vld [vmem:[#allocation2 + $0x8] sm:$0xff]  ;;  %v36_v2 = vld [vmem:[#allocation2] sm:$0xff]  ;;  %v111_v20 = vlaneseq }
   0xf   :  { %1769 = vmatprep.subr.mxu1 %v2005_v0  ;;  %1773 = vmatprep.mubr.msk.f32.mxu1 %vm2006_vm0, %v2005_v0  ;;  %v2051_v3 = vld [vmem:[%s2772_s0] sm:$0xff]  ;;  %vm115_vm1 = vcmask 130048   ;;  %v69_v4 = vld [vmem:[#allocation2 + $0x108] sm:$0xff]  ;;  %v67_v6 = vld [vmem:[#allocation2 + $0xf8] sm:$0xff]  ;;  %vm471_vm2 = vcmask 261120   ;;  %vm1520_vm3 = vcmask 138368  }
  0x10   :  { %1811 = vmatprep.subr.mxu0 %v2005_v0  ;;  %1843 = vmatprep.mubr.msk.f32.mxu0 %vm2006_vm0, %v2005_v0  ;;  %v68_v5 = vld [vmem:[#allocation2 + $0x100] sm:$0xff]  ;;  %v66_v7 = vld [vmem:[#allocation2 + $0xf0] sm:$0xff]  ;;  %v65_v8 = vld [vmem:[#allocation2 + $0xe8] sm:$0xff]  ;;  %v2056_v21 = vshrl.u32 %v111_v20, 7 }
  0x11   :  { %1770 = vmatpush3.msra.mxu1 %v37_v1  ;;  %v64_v9 = vld [vmem:[#allocation2 + $0xe0] sm:$0xff]  ;;  %v63_v10 = vld [vmem:[#allocation2 + $0xd8] sm:$0xff]  ;;  %v62_v11 = vld [vmem:[#allocation2 + $0xd0] sm:$0xff] }
  0x12   :  { %1771 = vmatprep.subr.mxu1 %v2005_v0  ;;  %v61_v12 = vld [vmem:[#allocation2 + $0xc8] sm:$0xff]  ;;  %v60_v13 = vld [vmem:[#allocation2 + $0xc0] sm:$0xff]  ;;  %v59_v14 = vld [vmem:[#allocation2 + $0xb8] sm:$0xff]  ;;  %v113_v22 = vsub.s32 0, %v2056_v21  ;;  %v273_v50 = vsub.s32 1, %v2056_v21  ;;  %v278_v51 = vsub.s32 2, %v2056_v21 }
  0x13   :  { %1772 = vmatpush3.msra.mxu1 %v36_v2  ;;  %v58_v15 = vld [vmem:[#allocation2 + $0xb0] sm:$0xff]  ;;  %v57_v16 = vld [vmem:[#allocation2 + $0xa8] sm:$0xff]  ;;  %v56_v17 = vld [vmem:[#allocation2 + $0xa0] sm:$0xff] }
  0x14   :  { %1774 = vmatmul.mubr.msk.f32.vlgmr.msra.gmra.mxu1 %vm115_vm1, %v2051_v3  ;;  %1776 = vmatprep.subr.mxu1 %v69_v4  ;;  %v55_v18 = vld [vmem:[#allocation2 + $0x98] sm:$0xff]  ;;  %v54_v19 = vld [vmem:[#allocation2 + $0x90] sm:$0xff]  ;;  %v53_v29 = vld [vmem:[#allocation2 + $0x88] sm:$0xff] }
  0x15   :  { %1777 = vmatpush3.msra.mxu1 %v69_v4  ;;  %v2059_v23 = vld [vmem:[#allocation2 + $0x110] sm:$0xff]  ;;  %v52_v30 = vld [vmem:[#allocation2 + $0x80] sm:$0xff]  ;;  %1812 = vmatpush3.msra.mxu0 %v53_v29  ;;  %v51_v31 = vld [vmem:[#allocation2 + $0x78] sm:$0xff] }
  0x16   :  { %1778 = vmatprep.subr.mxu1 %v68_v5  ;;  %v114_v24 = vrot.slane %v2059_v23, %v113_v22  ;;  %1813 = vmatprep.subr.mxu0 %v2005_v0  ;;  %v50_v32 = vld [vmem:[#allocation2 + $0x70] sm:$0xff]  ;;  %v49_v33 = vld [vmem:[#allocation2 + $0x68] sm:$0xff]  ;;  %v48_v34 = vld [vmem:[#allocation2 + $0x60] sm:$0xff]  ;;  %v2091_v53 = vrot.slane %v2059_v23, %v273_v50  ;;  %v279_v56 = vrot.slane %v2059_v23, %v278_v51 }
  0x17   :  { %1779 = vmatpush3.msra.mxu1 %v68_v5  ;;  %1814 = vmatpush3.msra.mxu0 %v52_v30  ;;  %v47_v35 = vld [vmem:[#allocation2 + $0x58] sm:$0xff]  ;;  %v46_v36 = vld [vmem:[#allocation2 + $0x50] sm:$0xff]  ;;  %v45_v37 = vld [vmem:[#allocation2 + $0x48] sm:$0xff] }
  0x18   :  { %1780 = vmatprep.subr.mxu1 %v67_v6  ;;  %1815 = vmatprep.subr.mxu0 %v2005_v0  ;;  %v44_v38 = vld [vmem:[#allocation2 + $0x40] sm:$0xff]  ;;  %v43_v39 = vld [vmem:[#allocation2 + $0x38] sm:$0xff]  ;;  %v42_v40 = vld [vmem:[#allocation2 + $0x30] sm:$0xff] }
  0x19   :  { %1781 = vmatpush3.msra.mxu1 %v67_v6  ;;  %1816 = vmatpush3.msra.mxu0 %v51_v31  ;;  %v41_v41 = vld [vmem:[#allocation2 + $0x28] sm:$0xff]  ;;  %v40_v42 = vld [vmem:[#allocation2 + $0x20] sm:$0xff]  ;;  %v39_v43 = vld [vmem:[#allocation2 + $0x18] sm:$0xff] }
  0x1a   :  { %1782 = vmatprep.subr.mxu1 %v66_v7  ;;  %1817 = vmatprep.subr.mxu0 %v2005_v0  ;;  %v38_v44 = vld [vmem:[#allocation2 + $0x10] sm:$0xff]  ;;  %v694_v29 = vld [vmem:[%s2774_s2 + $0x158] sm:$0xff] }
  0x1b   :  { %1783 = vmatpush3.msra.mxu1 %v66_v7  ;;  %1818 = vmatpush3.msra.mxu0 %v50_v32  ;;  %v709_v20 = vld [vmem:[%s2774_s2 + $0x1d0] sm:$0xff]  ;;  %v688_v32 = vld [vmem:[%s2774_s2 + $0x128] sm:$0xff] }
  0x1c   :  { %1784 = vmatprep.subr.mxu1 %v65_v8  ;;  %1819 = vmatprep.subr.mxu0 %v2005_v0  ;;  %v693_v30 = vld [vmem:[%s2774_s2 + $0x150] sm:$0xff] }
  0x1d   :  { %1785 = vmatpush3.msra.mxu1 %v65_v8  ;;  %1820 = vmatpush3.msra.mxu0 %v49_v33  ;;  %v689_v31 = vld [vmem:[%s2774_s2 + $0x130] sm:$0xff]  ;;  %v684_v33 = vld [vmem:[%s2774_s2 + $0x108] sm:$0xff] }
  0x1e   :  { %1786 = vmatprep.subr.mxu1 %v64_v9  ;;  %1821 = vmatprep.subr.mxu0 %v2005_v0 }
  0x1f   :  { %1787 = vmatpush3.msra.mxu1 %v64_v9  ;;  %1822 = vmatpush3.msra.mxu0 %v48_v34  ;;  %v683_v34 = vld [vmem:[%s2774_s2 + $0x100] sm:$0xff] }
  0x20   :  { %1788 = vmatprep.subr.mxu1 %v63_v10  ;;  %1823 = vmatprep.subr.mxu0 %v2005_v0 }
  0x21   :  { %1789 = vmatpush3.msra.mxu1 %v63_v10  ;;  %1824 = vmatpush3.msra.mxu0 %v47_v35  ;;  %v679_v35 = vld [vmem:[%s2774_s2 + $0xe0] sm:$0xff] }
  0x22   :  { %1790 = vmatprep.subr.mxu1 %v62_v11  ;;  %1825 = vmatprep.subr.mxu0 %v2005_v0 }
  0x23   :  { %1791 = vmatpush3.msra.mxu1 %v62_v11  ;;  %1826 = vmatpush3.msra.mxu0 %v46_v36  ;;  %v678_v36 = vld [vmem:[%s2774_s2 + $0xd8] sm:$0xff] }
  0x24   :  { %1792 = vmatprep.subr.mxu1 %v61_v12  ;;  %1827 = vmatprep.subr.mxu0 %v2005_v0 }
  0x25   :  { %1793 = vmatpush3.msra.mxu1 %v61_v12  ;;  %1828 = vmatpush3.msra.mxu0 %v45_v37  ;;  %v674_v37 = vld [vmem:[%s2774_s2 + $0xb8] sm:$0xff] }
  0x26   :  { %1794 = vmatprep.subr.mxu1 %v60_v13  ;;  %1829 = vmatprep.subr.mxu0 %v2005_v0 }
  0x27   :  { %1795 = vmatpush3.msra.mxu1 %v60_v13  ;;  %1830 = vmatpush3.msra.mxu0 %v44_v38  ;;  %v673_v38 = vld [vmem:[%s2774_s2 + $0xb0] sm:$0xff] }
  0x28   :  { %1796 = vmatprep.subr.mxu1 %v59_v14  ;;  %1831 = vmatprep.subr.mxu0 %v2005_v0 }
  0x29   :  { %1797 = vmatpush3.msra.mxu1 %v59_v14  ;;  %1832 = vmatpush3.msra.mxu0 %v43_v39  ;;  %v669_v39 = vld [vmem:[%s2774_s2 + $0x90] sm:$0xff] }
  0x2a   :  { %1798 = vmatprep.subr.mxu1 %v58_v15  ;;  %1833 = vmatprep.subr.mxu0 %v2005_v0 }
  0x2b   :  { %1799 = vmatpush3.msra.mxu1 %v58_v15  ;;  %1834 = vmatpush3.msra.mxu0 %v42_v40  ;;  %v668_v40 = vld [vmem:[%s2774_s2 + $0x88] sm:$0xff] }
  0x2c   :  { %1800 = vmatprep.subr.mxu1 %v57_v16  ;;  %1835 = vmatprep.subr.mxu0 %v2005_v0 }
  0x2d   :  { %1801 = vmatpush3.msra.mxu1 %v57_v16  ;;  %1836 = vmatpush3.msra.mxu0 %v41_v41  ;;  %v664_v41 = vld [vmem:[%s2774_s2 + $0x68] sm:$0xff] }
  0x2e   :  { %1802 = vmatprep.subr.mxu1 %v56_v17  ;;  %1837 = vmatprep.subr.mxu0 %v2005_v0 }
  0x2f   :  { %1803 = vmatpush3.msra.mxu1 %v56_v17  ;;  %1838 = vmatpush3.msra.mxu0 %v40_v42  ;;  %v663_v42 = vld [vmem:[%s2774_s2 + $0x60] sm:$0xff] }
  0x30   :  { %1804 = vmatprep.subr.mxu1 %v55_v18  ;;  %1839 = vmatprep.subr.mxu0 %v2005_v0 }
  0x31   :  { %1805 = vmatpush3.msra.mxu1 %v55_v18  ;;  %1840 = vmatpush3.msra.mxu0 %v39_v43  ;;  %v659_v43 = vld [vmem:[%s2774_s2 + $0x40] sm:$0xff] }
  0x32   :  { %1806 = vmatprep.subr.mxu1 %v54_v19  ;;  %1841 = vmatprep.subr.mxu0 %v2005_v0 }
  0x33   :  { %1807 = vmatpush3.msra.mxu1 %v54_v19  ;;  %1842 = vmatpush3.msra.mxu0 %v38_v44  ;;  %v658_v44 = vld [vmem:[%s2774_s2 + $0x38] sm:$0xff] }
  0x34   :  { %1846 = vmatprep.subr.mxu1 %v69_v4  ;;  %1881 = vmatprep.subr.mxu0 %v2005_v0 }
  0xd4   :  { %v185_v25 = vpop.f32.mrf.mxu1 }
  0xd5   :  { %v2064_v26 = vadd.f32 %v185_v25, %v114_v24  ;;  %v708_v24 = vld [vmem:[%s2774_s2 + $0x1c8] sm:$0xff] }
  0xd6   :  { %v1775_v27 = vpop.f32.mrf.mxu1  ;;  %v704_v25 = vld [vmem:[%s2774_s2 + $0x1a8] sm:$0xff] }
  0xd7   :  { %v189_v28 = vmul.f32 %v2064_v26, %v2064_v26  ;;  %1808 = vmatprep.mubr.f32.mxu1 %v2064_v26  ;;  %v699_v27 = vld [vmem:[%s2774_s2 + $0x180] sm:$0xff] }
  0xd9   :  { %1809 = vmatmul.mubr.f32.vlgmr.msra.gmra.mxu1 %v189_v28  ;;  %v698_v28 = vld [vmem:[%s2774_s2 + $0x178] sm:$0xff] }
  0xda   :  { %1847 = vmatpush3.msra.mxu1 %v69_v4 }
  0xdb   :  { %1848 = vmatprep.subr.mxu1 %v68_v5 }
  0xdc   :  { %1849 = vmatpush3.msra.mxu1 %v68_v5 }
  0xdd   :  { %1850 = vmatprep.subr.mxu1 %v67_v6 }
  0xde   :  { %1851 = vmatpush3.msra.mxu1 %v67_v6  ;;  %v290_v6 = vsub.s32 3, %v2056_v21 }
  0xdf   :  { %1852 = vmatprep.subr.mxu1 %v66_v7 }
  0xe0   :  { %1853 = vmatpush3.msra.mxu1 %v66_v7  ;;  %v291_v7 = vrot.slane %v2059_v23, %v290_v6 }
  0xe1   :  { %1854 = vmatprep.subr.mxu1 %v65_v8 }
  0xe2   :  { %1855 = vmatpush3.msra.mxu1 %v65_v8 }
  0xe3   :  { %1856 = vmatprep.subr.mxu1 %v64_v9 }
  0xe4   :  { %1857 = vmatpush3.msra.mxu1 %v64_v9 }
  0xe5   :  { %1858 = vmatprep.subr.mxu1 %v63_v10 }
  0xe6   :  { %1859 = vmatpush3.msra.mxu1 %v63_v10 }
  0xe7   :  { %1860 = vmatprep.subr.mxu1 %v62_v11 }
  0xe8   :  { %1861 = vmatpush3.msra.mxu1 %v62_v11 }
  0xe9   :  { %1862 = vmatprep.subr.mxu1 %v61_v12 }
  0xea   :  { %1863 = vmatpush3.msra.mxu1 %v61_v12  ;;  %v729_v12 = vld [vmem:[%s2774_s2 + $0x270] sm:$0xff] }
  0xeb   :  { %1864 = vmatprep.subr.mxu1 %v60_v13 }
  0xec   :  { %1865 = vmatpush3.msra.mxu1 %v60_v13  ;;  %v728_v13 = vld [vmem:[%s2774_s2 + $0x268] sm:$0xff] }
  0xed   :  { %1866 = vmatprep.subr.mxu1 %v59_v14 }
  0xee   :  { %1867 = vmatpush3.msra.mxu1 %v59_v14  ;;  %v724_v14 = vld [vmem:[%s2774_s2 + $0x248] sm:$0xff] }
  0xef   :  { %1868 = vmatprep.subr.mxu1 %v58_v15 }
  0xf0   :  { %1869 = vmatpush3.msra.mxu1 %v58_v15  ;;  %v723_v15 = vld [vmem:[%s2774_s2 + $0x240] sm:$0xff] }
  0xf1   :  { %1870 = vmatprep.subr.mxu1 %v57_v16 }
  0xf2   :  { %1871 = vmatpush3.msra.mxu1 %v57_v16  ;;  %v719_v16 = vld [vmem:[%s2774_s2 + $0x220] sm:$0xff] }
  0xf3   :  { %1872 = vmatprep.subr.mxu1 %v56_v17 }
  0xf4   :  { %1873 = vmatpush3.msra.mxu1 %v56_v17  ;;  %v718_v17 = vld [vmem:[%s2774_s2 + $0x218] sm:$0xff] }
  0xf5   :  { %1874 = vmatprep.subr.mxu1 %v55_v18 }
  0xf6   :  { %1875 = vmatpush3.msra.mxu1 %v55_v18  ;;  %v714_v18 = vld [vmem:[%s2774_s2 + $0x1f8] sm:$0xff] }
  0xf7   :  { %1876 = vmatprep.subr.mxu1 %v54_v19 }
  0xf8   :  { %1877 = vmatpush3.msra.mxu1 %v54_v19  ;;  %v713_v19 = vld [vmem:[%s2774_s2 + $0x1f0] sm:$0xff] }
  0xf9   :  { %832 = vmatprep.subr.mxu1 %v729_v12 }
 0x199   :  { %v1810_v45 = vpop.f32.mrf.mxu1 }
 0x19b   :  { %v256_v46 = vpop.f32.mrf.mxu1 }
 0x19c   :  { %v265_v47 = vmul.f32 %v256_v46, %v256_v46  ;;  %v269_v52 = vsub.f32 %v2064_v26, %v256_v46  ;;  %v703_v26 = vld [vmem:[%s2774_s2 + $0x1a0] sm:$0xff]  ;;  %v653_v46 = vld [vmem:[%s2774_s2 + $0x10] sm:$0xff] }
 0x19e   :  { %v266_v48 = vsub.f32 %v1810_v45, %v265_v47  ;;  %v654_v45 = vld [vmem:[%s2774_s2 + $0x18] sm:$0xff] }
 0x1a0   :  { %v267_v49 = vadd.f32 1e-05, %v266_v48 }
 0x1a2   :  { %1946 = vrsqrt.f32 %v267_v49 }
 0x1af   :  { %v2093_v54 = vpop.eup %1946 }
 0x1b0   :  { %v2096_v55 = vmul.f32 %v2093_v54, %v269_v52 }
 0x1b2   :  { %v275_v57 = vmul.f32 %v2091_v53, %v2096_v55 }
 0x1b4   :  { %v280_v58 = vadd.f32 %v279_v56, %v275_v57  ;;  %v446_v57 = vsub.s32 4, %v2056_v21 }
 0x1b6   :  { %v1538_v59 = vmul.f32 -1.442695, %v280_v58 }
 0x1b8   :  { %1948 = vpow2.f32 %v1538_v59 }
 0x1c5   :  { %v1949_v60 = vpop.eup %1948 }
 0x1c6   :  { %v284_v61 = vadd.f32 1.0, %v1949_v60  ;;  %v447_v60 = vrot.slane %v2059_v23, %v446_v57 }
 0x1c8   :  { %1950 = vrcp.f32 %v284_v61 }
 0x1d5   :  { %v1951_v62 = vpop.eup %1950 }
 0x1d6   :  { %v287_v63 = vmul.f32 %v1951_v62, %v280_v58  ;;  %v559_v1 = vsub.f32 1.0, %v1951_v62 }
 0x1d8   :  { %1844 = vmatmul.mubr.f32.vlgmr.msra.gmra.mxu0 %v287_v63  ;;  %v560_v2 = vmul.f32 %v559_v1, %v280_v58  ;;  %v451_v58 = vsub.s32 5, %v2056_v21 }
 0x1d9   :  { %1889 = vmatprep.mubr.msk.f32.mxu0 %vm2006_vm0, %v2005_v0 }
 0x1da   :  { %v561_v4 = vadd.f32 1.0, %v560_v2  ;;  %v452_v63 = vrot.slane %v2059_v23, %v451_v58 }
 0x1dc   :  { %v2105_v5 = vmul.f32 %v1951_v62, %v561_v4 }
 0x298   :  { %v358_v8 = vpop.f32.mrf.mxu0 }
 0x299   :  { %v2111_v9 = vadd.f32 %v358_v8, %v291_v7 }
 0x29a   :  { %v1845_v10 = vpop.f32.mrf.mxu0 }
 0x29b   :  { %v362_v11 = vmul.f32 %v2111_v9, %v2111_v9  ;;  %1878 = vmatprep.mubr.f32.mxu1 %v2111_v9 }
 0x29d   :  { %1879 = vmatmul.mubr.f32.vlgmr.msra.gmra.mxu1 %v362_v11 }
 0x29e   :  { %896 = vmatprep.mubr.f32.mxu1 %v2005_v0  ;;  %833 = vmatpush1.msra.mxu1 %v728_v13 }
 0x29f   :  { %834 = vmatprep.subr.mxu1 %v724_v14 }
 0x2a0   :  { %835 = vmatpush1.msra.mxu1 %v723_v15 }
 0x2a1   :  { %836 = vmatprep.subr.mxu1 %v719_v16 }
 0x2a2   :  { %837 = vmatpush1.msra.mxu1 %v718_v17 }
 0x2a3   :  { %838 = vmatprep.subr.mxu1 %v714_v18 }
 0x2a4   :  { %839 = vmatpush1.msra.mxu1 %v713_v19 }
 0x2a5   :  { %840 = vmatprep.subr.mxu1 %v709_v20 }
 0x2a6   :  { %841 = vmatpush1.msra.mxu1 %v708_v24 }
 0x2a7   :  { %842 = vmatprep.subr.mxu1 %v704_v25  ;;  %v74_v25 = vld [vmem:[#allocation2 + $0x130] sm:$0xff] }
 0x2a8   :  { %843 = vmatpush1.msra.mxu1 %v703_v26  ;;  %1882 = vmatpush3.msra.mxu0 %v74_v25  ;;  %v73_v26 = vld [vmem:[#allocation2 + $0x128] sm:$0xff]  ;;  %v677_v25 = vld [vmem:[%s2774_s2 + $0xd0] sm:$0xff] }
 0x2a9   :  { %844 = vmatprep.subr.mxu1 %v699_v27  ;;  %1883 = vmatprep.subr.mxu0 %v2005_v0  ;;  %v71_v27 = vld [vmem:[#allocation2 + $0x118] sm:$0xff] }
 0x2aa   :  { %845 = vmatpush1.msra.mxu1 %v698_v28  ;;  %1884 = vmatpush3.msra.mxu0 %v73_v26  ;;  %v676_v26 = vld [vmem:[%s2774_s2 + $0xc8] sm:$0xff] }
 0x2ab   :  { %846 = vmatprep.subr.mxu1 %v694_v29  ;;  %1885 = vmatprep.subr.mxu0 %v2005_v0 }
 0x2ac   :  { %847 = vmatpush1.msra.mxu1 %v693_v30 }
 0x2ad   :  { %848 = vmatprep.subr.mxu1 %v689_v31 }
 0x2ae   :  { %849 = vmatpush1.msra.mxu1 %v688_v32 }
 0x2af   :  { %850 = vmatprep.subr.mxu1 %v684_v33 }
 0x2b0   :  { %851 = vmatpush1.msra.mxu1 %v683_v34 }
 0x2b1   :  { %852 = vmatprep.subr.mxu1 %v679_v35 }
 0x2b2   :  { %853 = vmatpush1.msra.mxu1 %v678_v36 }
 0x2b3   :  { %854 = vmatprep.subr.mxu1 %v674_v37 }
 0x2b4   :  { %855 = vmatpush1.msra.mxu1 %v673_v38 }
 0x2b5   :  { %856 = vmatprep.subr.mxu1 %v669_v39 }
 0x2b6   :  { %857 = vmatpush1.msra.mxu1 %v668_v40 }
 0x2b7   :  { %858 = vmatprep.subr.mxu1 %v664_v41 }
 0x2b8   :  { %859 = vmatpush1.msra.mxu1 %v663_v42 }
 0x2b9   :  { %860 = vmatprep.subr.mxu1 %v659_v43  ;;  %v78_v43 = vld [vmem:[#allocation2 + $0x150] sm:$0xff] }
 0x2ba   :  { %861 = vmatpush1.msra.mxu1 %v658_v44  ;;  %v77_v44 = vld [vmem:[#allocation2 + $0x148] sm:$0xff] }
 0x2bb   :  { %862 = vmatprep.subr.mxu1 %v654_v45  ;;  %v727_v45 = vld [vmem:[%s2774_s2 + $0x260] sm:$0xff] }
 0x2bc   :  { %863 = vmatpush1.msra.mxu1 %v653_v46  ;;  %v978_v46 = vld [vmem:[%s2775_s3 + $0x28] sm:$0xff] }
 0x2bd   :  { %1012 = vmatprep.subr.mxu1 %v978_v46  ;;  %v670_v46 = vld [vmem:[%s2774_s2 + $0x98] sm:$0xff] }
 0x35d   :  { %v1880_v47 = vpop.f32.mrf.mxu1 }
 0x35f   :  { %v429_v48 = vpop.f32.mrf.mxu1 }
 0x360   :  { %v438_v49 = vmul.f32 %v429_v48, %v429_v48  ;;  %v442_v59 = vsub.f32 %v2111_v9, %v429_v48  ;;  %v467_v9 = vsub.s32 6, %v2056_v21  ;;  %v974_v48 = vld [vmem:[%s2775_s3 + $0x8] sm:$0xff]  ;;  %v1251_v21 = vld [vmem:[%s2776_s4 + $0x178] sm:$0xff] }
 0x362   :  { %v439_v52 = vsub.f32 %v1880_v47, %v438_v49  ;;  %v468_v15 = vrot.slane %v2059_v23, %v467_v9  ;;  %v72_v23 = vld [vmem:[#allocation2 + $0x120] sm:$0xff]  ;;  %v2007_v49 = vmov 16   ;;  %v702_v9 = vld [vmem:[%s2774_s2 + $0x198] sm:$0xff] }
 0x363   :  { %1886 = vmatpush3.msra.mxu0 %v72_v23  ;;  %v977_v47 = vld [vmem:[%s2775_s3 + $0x20] sm:$0xff]  ;;  %1945 = vset.pattern.permute.xlu0 %v2007_v49  ;;  %v672_v23 = vld [vmem:[%s2774_s2 + $0xa8] sm:$0xff] }
 0x364   :  { %v440_v56 = vadd.f32 1e-05, %v439_v52  ;;  %1887 = vmatprep.subr.mxu0 %v2005_v0  ;;  %v973_v52 = vld [vmem:[%s2775_s3] sm:$0xff] }
 0x365   :  { %1888 = vmatpush3.msra.mxu0 %v71_v27  ;;  %v671_v27 = vld [vmem:[%s2774_s2 + $0xa0] sm:$0xff] }
 0x366   :  { %1952 = vrsqrt.f32 %v440_v56  ;;  %1892 = vmatprep.subr.mxu0 %v2005_v0  ;;  %v655_v49 = vld [vmem:[%s2774_s2 + $0x20] sm:$0xff] }
 0x373   :  { %v1953_v61 = vpop.eup %1952 }
 0x374   :  { %v443_v62 = vmul.f32 %v1953_v61, %v442_v59 }
 0x376   :  { %v448_v1 = vmul.f32 %v447_v60, %v443_v62 }
 0x378   :  { %v453_v2 = vadd.f32 %v452_v63, %v448_v1 }
 0x37a   :  { %v1539_v4 = vmul.f32 -1.442695, %v453_v2 }
 0x37c   :  { %1954 = vpow2.f32 %v1539_v4  ;;  %v721_v4 = vld [vmem:[%s2774_s2 + $0x230] sm:$0xff] }
 0x389   :  { %v1955_v7 = vpop.eup %1954 }
 0x38a   :  { %v457_v8 = vadd.f32 1.0, %v1955_v7  ;;  %v712_v7 = vld [vmem:[%s2774_s2 + $0x1e8] sm:$0xff] }
 0x38c   :  { %1956 = vrcp.f32 %v457_v8  ;;  %v711_v8 = vld [vmem:[%s2774_s2 + $0x1e0] sm:$0xff] }
 0x399   :  { %v1957_v10 = vpop.eup %1956 }
 0x39a   :  { %v2220_v11 = vmul.f32 %v1957_v10, %v453_v2  ;;  %v461_v12 = vsub.f32 1.0, %v1957_v10 }
 0x39c   :  { %897 = vmatmul.mubr.f32.vlgmr.msra.gmra.mxu1 %v2220_v11  ;;  %v462_v13 = vmul.f32 %v461_v12, %v453_v2  ;;  %v726_v2 = vld [vmem:[%s2774_s2 + $0x258] sm:$0xff] }
 0x39d   :  { %1048 = vmatprep.mubr.f32.mxu1 %v2005_v0  ;;  %1013 = vmatpush1.msra.mxu1 %v977_v47  ;;  %v706_v12 = vld [vmem:[%s2774_s2 + $0x1b8] sm:$0xff]  ;;  %v665_v47 = vld [vmem:[%s2774_s2 + $0x70] sm:$0xff] }
 0x39e   :  { %v463_v14 = vadd.f32 1.0, %v462_v13  ;;  %1014 = vmatprep.subr.mxu1 %v974_v48  ;;  %v701_v13 = vld [vmem:[%s2774_s2 + $0x190] sm:$0xff]  ;;  %v660_v48 = vld [vmem:[%s2774_s2 + $0x48] sm:$0xff] }
 0x39f   :  { %1015 = vmatpush1.msra.mxu1 %v973_v52  ;;  %v980_v52 = vld [vmem:[%s2775_s3 + $0x38] sm:$0xff] }
 0x3a0   :  { %v464_v16 = vmul.f32 %v1957_v10, %v463_v14  ;;  %v707_v10 = vld [vmem:[%s2774_s2 + $0x1c0] sm:$0xff]  ;;  %v697_v14 = vld [vmem:[%s2774_s2 + $0x170] sm:$0xff]  ;;  %1083 = vmatprep.subr.mxu1 %v980_v52  ;;  %v97_v52 = vld [vmem:[#allocation2 + $0x1e8] sm:$0xff] }
 0x3a2   :  { %v469_v17 = vmul.f32 %v468_v15, %v464_v16  ;;  %v696_v15 = vld [vmem:[%s2774_s2 + $0x168] sm:$0xff] }
 0x3a3   :  { %v692_v16 = vld [vmem:[%s2774_s2 + $0x148] sm:$0xff] }
 0x3a4   :  { %v470_v18 = vmul.f32 %v469_v17, %v447_v60  ;;  %v691_v17 = vld [vmem:[%s2774_s2 + $0x140] sm:$0xff] }
 0x3a6   :  { %v472_v19 = vsel %vm471_vm2, %v470_v18, 0.0  ;;  %v477_v20 = vmul.f32 %v470_v18, %v443_v62 }
 0x3a7   :  { %473 = vadd.xlane.f32.xlu0 %v472_v19  ;;  %v686_v19 = vld [vmem:[%s2774_s2 + $0x118] sm:$0xff] }
 0x3a8   :  { %v478_v24 = vsel %vm471_vm2, %v477_v20, 0.0  ;;  %v682_v20 = vld [vmem:[%s2774_s2 + $0xf8] sm:$0xff] }
 0x3ab   :  { %479 = vadd.xlane.f32.xlu0 %v478_v24  ;;  %v681_v24 = vld [vmem:[%s2774_s2 + $0xf0] sm:$0xff] }
 0x3c1   :  { %1301 = vperm.xlu0 %1945, %v2051_v3   ;;  %v722_v3 = vld [vmem:[%s2774_s2 + $0x238] sm:$0xff] }
 0x430   :  { %v474_v28 = vpop.xlane.xlu0 %473 }
 0x431   :  { %v476_v29 = vmul.f32 0.03125, %v474_v28  ;;  %v667_v28 = vld [vmem:[%s2774_s2 + $0x80] sm:$0xff] }
 0x433   :  { %v482_v32 = vsub.f32 %v470_v18, %v476_v29  ;;  %v687_v18 = vld [vmem:[%s2774_s2 + $0x120] sm:$0xff]  ;;  %v666_v29 = vld [vmem:[%s2774_s2 + $0x78] sm:$0xff] }
 0x434   :  { %v480_v30 = vpop.xlane.xlu0 %479 }
 0x435   :  { %v481_v31 = vmul.f32 0.03125, %v480_v30  ;;  %v662_v30 = vld [vmem:[%s2774_s2 + $0x58] sm:$0xff] }
 0x437   :  { %v483_v33 = vmul.f32 %v481_v31, %v443_v62  ;;  %v661_v31 = vld [vmem:[%s2774_s2 + $0x50] sm:$0xff] }
 0x439   :  { %v484_v34 = vsub.f32 %v482_v32, %v483_v33  ;;  %v657_v32 = vld [vmem:[%s2774_s2 + $0x30] sm:$0xff]  ;;  %v656_v33 = vld [vmem:[%s2774_s2 + $0x28] sm:$0xff] }
 0x43b   :  { %v485_v35 = vmul.f32 %v1953_v61, %v484_v34  ;;  %v652_v34 = vld [vmem:[%s2774_s2 + $0x8] sm:$0xff] }
 0x43d   :  { %1890 = vmatmul.mubr.msk.f32.vlgmr.msra.gmra.mxu0 %vm471_vm2, %v485_v35  ;;  %v651_v35 = vld [vmem:[%s2774_s2] sm:$0xff] }
 0x43e   :  { %1900 = vmatprep.mubr.msk.f32.mxu0 %vm2006_vm0, %v2005_v0  ;;  %1893 = vmatpush3.msra.mxu0 %v78_v43  ;;  %v695_v43 = vld [vmem:[%s2774_s2 + $0x160] sm:$0xff] }
 0x43f   :  { %1894 = vmatprep.subr.mxu0 %v2005_v0 }
 0x440   :  { %1895 = vmatpush3.msra.mxu0 %v77_v44  ;;  %v690_v44 = vld [vmem:[%s2774_s2 + $0x138] sm:$0xff] }
 0x441   :  { %1896 = vmatprep.subr.mxu0 %v2005_v0 }
 0x4fd   :  { %v555_v36 = vpop.f32.mrf.mxu0 }
 0x4fe   :  { %v563_v37 = vmul.f32 %v2105_v5, %v555_v36  ;;  %v76_v5 = vld [vmem:[#allocation2 + $0x140] sm:$0xff]  ;;  %v730_v36 = vld [vmem:[%s2774_s2 + $0x278] sm:$0xff] }
 0x4ff   :  { %v1891_v38 = vpop.f32.mrf.mxu0  ;;  %1897 = vmatpush3.msra.mxu0 %v76_v5  ;;  %v685_v5 = vld [vmem:[%s2774_s2 + $0x110] sm:$0xff] }
 0x500   :  { %v564_v39 = vmul.f32 %v563_v37, %v2091_v53  ;;  %1898 = vmatprep.subr.mxu0 %v2005_v0  ;;  %v75_v53 = vld [vmem:[#allocation2 + $0x138] sm:$0xff]  ;;  %v725_v37 = vld [vmem:[%s2774_s2 + $0x250] sm:$0xff]  ;;  %v720_v38 = vld [vmem:[%s2774_s2 + $0x228] sm:$0xff] }
 0x501   :  { %1899 = vmatpush3.msra.mxu0 %v75_v53  ;;  %v680_v53 = vld [vmem:[%s2774_s2 + $0xe8] sm:$0xff] }
 0x502   :  { %v565_v40 = vsel %vm471_vm2, %v564_v39, 0.0  ;;  %v569_v41 = vmul.f32 %v564_v39, %v2096_v55  ;;  %761 = vmatprep.subr.mxu0 %v727_v45  ;;  %v675_v45 = vld [vmem:[%s2774_s2 + $0xc0] sm:$0xff] }
 0x503   :  { %566 = vadd.xlane.f32.xlu1 %v565_v40  ;;  %v710_v40 = vld [vmem:[%s2774_s2 + $0x1d8] sm:$0xff] }
 0x504   :  { %v570_v42 = vsel %vm471_vm2, %v569_v41, 0.0  ;;  %v705_v41 = vld [vmem:[%s2774_s2 + $0x1b0] sm:$0xff] }
 0x507   :  { %571 = vadd.xlane.f32.xlu1 %v570_v42  ;;  %v700_v42 = vld [vmem:[%s2774_s2 + $0x188] sm:$0xff] }
 0x58c   :  { %v567_v56 = vpop.xlane.xlu1 %566 }
 0x58d   :  { %v568_v58 = vmul.f32 0.03125, %v567_v56  ;;  %v1235_v56 = vld [vmem:[%s2776_s4 + $0xf8] sm:$0xff] }
 0x58f   :  { %v574_v61 = vsub.f32 %v564_v39, %v568_v58  ;;  %v715_v39 = vld [vmem:[%s2774_s2 + $0x200] sm:$0xff]  ;;  %v1219_v58 = vld [vmem:[%s2776_s4 + $0x78] sm:$0xff] }
 0x590   :  { %v572_v59 = vpop.xlane.xlu1 %571 }
 0x591   :  { %v573_v60 = vmul.f32 0.03125, %v572_v59  ;;  %v1234_v59 = vld [vmem:[%s2776_s4 + $0xf0] sm:$0xff] }
 0x593   :  { %v575_v62 = vmul.f32 %v573_v60, %v2096_v55  ;;  %v717_v55 = vld [vmem:[%s2774_s2 + $0x210] sm:$0xff]  ;;  %v1233_v60 = vld [vmem:[%s2776_s4 + $0xe8] sm:$0xff] }
 0x595   :  { %v576_v63 = vsub.f32 %v574_v61, %v575_v62  ;;  %v1217_v61 = vld [vmem:[%s2776_s4 + $0x68] sm:$0xff]  ;;  %v1232_v62 = vld [vmem:[%s2776_s4 + $0xe0] sm:$0xff] }
 0x597   :  { %v577_v1 = vmul.f32 %v2093_v54, %v576_v63  ;;  %v716_v54 = vld [vmem:[%s2774_s2 + $0x208] sm:$0xff]  ;;  %v1216_v63 = vld [vmem:[%s2776_s4 + $0x60] sm:$0xff] }
 0x599   :  { %1901 = vmatmul.mubr.msk.f32.vlgmr.msra.gmra.mxu0 %vm471_vm2, %v577_v1  ;;  %v1231_v1 = vld [vmem:[%s2776_s4 + $0xd8] sm:$0xff] }
 0x59a   :  { %762 = vmatpush1.msra.mxu0 %v726_v2  ;;  %825 = vmatprep.mubr.f32.mxu0 %v2005_v0  ;;  %v1215_v2 = vld [vmem:[%s2776_s4 + $0x58] sm:$0xff] }
 0x59b   :  { %763 = vmatprep.subr.mxu0 %v722_v3  ;;  %v1230_v3 = vld [vmem:[%s2776_s4 + $0xd0] sm:$0xff] }
 0x59c   :  { %764 = vmatpush1.msra.mxu0 %v721_v4  ;;  %v1214_v4 = vld [vmem:[%s2776_s4 + $0x50] sm:$0xff] }
 0x59d   :  { %765 = vmatprep.subr.mxu0 %v717_v55  ;;  %v1229_v55 = vld [vmem:[%s2776_s4 + $0xc8] sm:$0xff] }
 0x59e   :  { %766 = vmatpush1.msra.mxu0 %v716_v54  ;;  %v1213_v54 = vld [vmem:[%s2776_s4 + $0x48] sm:$0xff] }
 0x59f   :  { %767 = vmatprep.subr.mxu0 %v712_v7  ;;  %v1228_v7 = vld [vmem:[%s2776_s4 + $0xc0] sm:$0xff] }
 0x5a0   :  { %768 = vmatpush1.msra.mxu0 %v711_v8  ;;  %v1212_v8 = vld [vmem:[%s2776_s4 + $0x40] sm:$0xff] }
 0x5a1   :  { %769 = vmatprep.subr.mxu0 %v707_v10  ;;  %v1227_v10 = vld [vmem:[%s2776_s4 + $0xb8] sm:$0xff] }
 0x5a2   :  { %770 = vmatpush1.msra.mxu0 %v706_v12  ;;  %v1211_v12 = vld [vmem:[%s2776_s4 + $0x38] sm:$0xff] }
 0x5a3   :  { %771 = vmatprep.subr.mxu0 %v702_v9  ;;  %v1226_v9 = vld [vmem:[%s2776_s4 + $0xb0] sm:$0xff] }
 0x5a4   :  { %772 = vmatpush1.msra.mxu0 %v701_v13  ;;  %v1210_v13 = vld [vmem:[%s2776_s4 + $0x30] sm:$0xff] }
 0x5a5   :  { %773 = vmatprep.subr.mxu0 %v697_v14  ;;  %v1225_v14 = vld [vmem:[%s2776_s4 + $0xa8] sm:$0xff] }
 0x5a6   :  { %774 = vmatpush1.msra.mxu0 %v696_v15  ;;  %v1209_v15 = vld [vmem:[%s2776_s4 + $0x28] sm:$0xff] }
 0x5a7   :  { %775 = vmatprep.subr.mxu0 %v692_v16  ;;  %v1224_v16 = vld [vmem:[%s2776_s4 + $0xa0] sm:$0xff] }
 0x5a8   :  { %776 = vmatpush1.msra.mxu0 %v691_v17  ;;  %v1208_v17 = vld [vmem:[%s2776_s4 + $0x20] sm:$0xff] }
 0x5a9   :  { %777 = vmatprep.subr.mxu0 %v687_v18  ;;  %v1223_v18 = vld [vmem:[%s2776_s4 + $0x98] sm:$0xff] }
 0x5aa   :  { %778 = vmatpush1.msra.mxu0 %v686_v19  ;;  %v1207_v19 = vld [vmem:[%s2776_s4 + $0x18] sm:$0xff] }
 0x5ab   :  { %779 = vmatprep.subr.mxu0 %v682_v20  ;;  %v979_v20 = vld [vmem:[%s2775_s3 + $0x30] sm:$0xff] }
 0x5ac   :  { %780 = vmatpush1.msra.mxu0 %v681_v24 }
 0x5ad   :  { %781 = vmatprep.subr.mxu0 %v677_v25  ;;  %v976_v25 = vld [vmem:[%s2775_s3 + $0x18] sm:$0xff] }
 0x5ae   :  { %782 = vmatpush1.msra.mxu0 %v676_v26  ;;  %v975_v26 = vld [vmem:[%s2775_s3 + $0x10] sm:$0xff] }
 0x5af   :  { %783 = vmatprep.subr.mxu0 %v672_v23 }
 0x5b0   :  { %784 = vmatpush1.msra.mxu0 %v671_v27  ;;  %v110_v27 = vld [vmem:[#allocation2 + $0x250] sm:$0xff] }
 0x5b1   :  { %785 = vmatprep.subr.mxu0 %v667_v28  ;;  %v94_v28 = vld [vmem:[#allocation2 + $0x1d0] sm:$0xff] }
 0x5b2   :  { %786 = vmatpush1.msra.mxu0 %v666_v29  ;;  %v109_v29 = vld [vmem:[#allocation2 + $0x248] sm:$0xff] }
 0x5b3   :  { %787 = vmatprep.subr.mxu0 %v662_v30  ;;  %v93_v30 = vld [vmem:[#allocation2 + $0x1c8] sm:$0xff] }
 0x5b4   :  { %788 = vmatpush1.msra.mxu0 %v661_v31  ;;  %v108_v31 = vld [vmem:[#allocation2 + $0x240] sm:$0xff] }
 0x5b5   :  { %789 = vmatprep.subr.mxu0 %v657_v32  ;;  %v92_v32 = vld [vmem:[#allocation2 + $0x1c0] sm:$0xff] }
 0x5b6   :  { %790 = vmatpush1.msra.mxu0 %v656_v33  ;;  %v107_v33 = vld [vmem:[#allocation2 + $0x238] sm:$0xff] }
 0x5b7   :  { %791 = vmatprep.subr.mxu0 %v652_v34  ;;  %v91_v34 = vld [vmem:[#allocation2 + $0x1b8] sm:$0xff] }
 0x5b8   :  { %792 = vmatpush1.msra.mxu0 %v651_v35  ;;  %v90_v35 = vld [vmem:[#allocation2 + $0x1b0] sm:$0xff] }
 0x5b9   :  { %826 = vmatmul.mubr.f32.vlgmr.msra.gmra.mxu0 %v2220_v11  ;;  %1903 = vmatprep.subr.mxu0 %v2005_v0 }
 0x5ba   :  { %1904 = vmatpush3.msra.mxu0 %v730_v36  ;;  %1935 = vmatprep.mubr.msk.f32.mxu0 %vm2006_vm0, %v2005_v0  ;;  %v105_v36 = vld [vmem:[#allocation2 + $0x228] sm:$0xff] }
 0x5bb   :  { %1905 = vmatprep.subr.mxu0 %v2005_v0 }
 0x5bc   :  { %1906 = vmatpush3.msra.mxu0 %v725_v37  ;;  %v89_v37 = vld [vmem:[#allocation2 + $0x1a8] sm:$0xff] }
 0x5bd   :  { %1907 = vmatprep.subr.mxu0 %v2005_v0 }
 0x5be   :  { %1908 = vmatpush3.msra.mxu0 %v720_v38  ;;  %v104_v38 = vld [vmem:[#allocation2 + $0x220] sm:$0xff] }
 0x5bf   :  { %1909 = vmatprep.subr.mxu0 %v2005_v0 }
 0x5c0   :  { %1910 = vmatpush3.msra.mxu0 %v715_v39  ;;  %v88_v39 = vld [vmem:[#allocation2 + $0x1a0] sm:$0xff] }
 0x5c1   :  { %1911 = vmatprep.subr.mxu0 %v2005_v0 }
 0x5c2   :  { %1912 = vmatpush3.msra.mxu0 %v710_v40  ;;  %v103_v40 = vld [vmem:[#allocation2 + $0x218] sm:$0xff] }
 0x5c3   :  { %1913 = vmatprep.subr.mxu0 %v2005_v0 }
 0x5c4   :  { %1914 = vmatpush3.msra.mxu0 %v705_v41  ;;  %v87_v41 = vld [vmem:[#allocation2 + $0x198] sm:$0xff] }
 0x5c5   :  { %1915 = vmatprep.subr.mxu0 %v2005_v0 }
 0x5c6   :  { %1916 = vmatpush3.msra.mxu0 %v700_v42  ;;  %v102_v42 = vld [vmem:[#allocation2 + $0x210] sm:$0xff] }
 0x5c7   :  { %1917 = vmatprep.subr.mxu0 %v2005_v0 }
 0x5c8   :  { %1918 = vmatpush3.msra.mxu0 %v695_v43  ;;  %v86_v43 = vld [vmem:[#allocation2 + $0x190] sm:$0xff] }
 0x5c9   :  { %1919 = vmatprep.subr.mxu0 %v2005_v0 }
 0x5ca   :  { %1920 = vmatpush3.msra.mxu0 %v690_v44  ;;  %v101_v44 = vld [vmem:[#allocation2 + $0x208] sm:$0xff] }
 0x5cb   :  { %1921 = vmatprep.subr.mxu0 %v2005_v0 }
 0x5cc   :  { %1922 = vmatpush3.msra.mxu0 %v685_v5  ;;  %v85_v5 = vld [vmem:[#allocation2 + $0x188] sm:$0xff] }
 0x5cd   :  { %1923 = vmatprep.subr.mxu0 %v2005_v0 }
 0x5ce   :  { %1924 = vmatpush3.msra.mxu0 %v680_v53  ;;  %v100_v53 = vld [vmem:[#allocation2 + $0x200] sm:$0xff] }
 0x5cf   :  { %1925 = vmatprep.subr.mxu0 %v2005_v0 }
 0x5d0   :  { %1926 = vmatpush3.msra.mxu0 %v675_v45  ;;  %v84_v45 = vld [vmem:[#allocation2 + $0x180] sm:$0xff] }
 0x5d1   :  { %1927 = vmatprep.subr.mxu0 %v2005_v0 }
 0x5d2   :  { %1928 = vmatpush3.msra.mxu0 %v670_v46  ;;  %v99_v46 = vld [vmem:[#allocation2 + $0x1f8] sm:$0xff] }
 0x5d3   :  { %1929 = vmatprep.subr.mxu0 %v2005_v0 }
 0x5d4   :  { %1930 = vmatpush3.msra.mxu0 %v665_v47  ;;  %v83_v47 = vld [vmem:[#allocation2 + $0x178] sm:$0xff] }
 0x5d5   :  { %1931 = vmatprep.subr.mxu0 %v2005_v0 }
 0x5d6   :  { %1932 = vmatpush3.msra.mxu0 %v660_v48  ;;  %v98_v48 = vld [vmem:[#allocation2 + $0x1f0] sm:$0xff] }
 0x5d7   :  { %1933 = vmatprep.subr.mxu0 %v2005_v0 }
 0x5d8   :  { %1934 = vmatpush3.msra.mxu0 %v655_v49  ;;  %v82_v49 = vld [vmem:[#allocation2 + $0x170] sm:$0xff] }
 0x5d9   :  { %1936 = vmatmul.mubr.f32.vlgmr.msra.gmra.mxu0 %v2220_v11  ;;  %1664 = vmatprep.subr.mxu0 %v1235_v56  ;;  %v1218_v11 = vld [vmem:[%s2776_s4 + $0x70] sm:$0xff] }
 0x5da   :  { %1665 = vmatpush3.msra.mxu0 %v1219_v58  ;;  %v1542_v56 = vld [vmem:[%s2774_s2 + $0x280] ss:$8 sm:$0xf] }
 0x5db   :  { %1666 = vmatprep.subr.mxu0 %v1234_v59  ;;  %v1543_v58 = vld [vmem:[%s2774_s2 + $0x280] ss:$8 sm:$0x10] }
 0x5dc   :  { %1667 = vmatpush3.msra.mxu0 %v1218_v11  ;;  %v734_v11 = vor.u32 %v1543_v58, %v1542_v56  ;;  %v1261_v56 = vld [vmem:[%s2776_s4 + $0x1c8] sm:$0xff]  ;;  %v1278_v58 = vld [vmem:[%s2776_s4 + $0x250] sm:$0xff] }
 0x5dd   :  { %1668 = vmatprep.subr.mxu0 %v1233_v60 }
 0x5de   :  { %1669 = vmatpush3.msra.mxu0 %v1217_v61  ;;  %v755_v60 = vrot.slane %v734_v11, %v446_v57 }
 0x5df   :  { %1670 = vmatprep.subr.mxu0 %v1232_v62 }
 0x5e0   :  { %1671 = vmatpush3.msra.mxu0 %v1216_v63 }
 0x5e1   :  { %1672 = vmatprep.subr.mxu0 %v1231_v1  ;;  %v81_v1 = vld [vmem:[#allocation2 + $0x168] sm:$0xff] }
 0x5e2   :  { %1673 = vmatpush3.msra.mxu0 %v1215_v2  ;;  %v1222_v2 = vld [vmem:[%s2776_s4 + $0x90] sm:$0xff] }
 0x5e3   :  { %1674 = vmatprep.subr.mxu0 %v1230_v3 }
 0x5e4   :  { %1675 = vmatpush3.msra.mxu0 %v1214_v4  ;;  %v96_v4 = vld [vmem:[#allocation2 + $0x1e0] sm:$0xff] }
 0x5e5   :  { %1676 = vmatprep.subr.mxu0 %v1229_v55  ;;  %v1206_v55 = vld [vmem:[%s2776_s4 + $0x10] sm:$0xff] }
 0x5e6   :  { %1677 = vmatpush3.msra.mxu0 %v1213_v54  ;;  %v80_v54 = vld [vmem:[#allocation2 + $0x160] sm:$0xff] }
 0x5e7   :  { %1678 = vmatprep.subr.mxu0 %v1228_v7  ;;  %v1221_v7 = vld [vmem:[%s2776_s4 + $0x88] sm:$0xff] }
 0x5e8   :  { %1679 = vmatpush3.msra.mxu0 %v1212_v8  ;;  %v95_v8 = vld [vmem:[#allocation2 + $0x1d8] sm:$0xff] }
 0x5e9   :  { %1680 = vmatprep.subr.mxu0 %v1227_v10  ;;  %v1205_v10 = vld [vmem:[%s2776_s4 + $0x8] sm:$0xff] }
 0x5ea   :  { %1681 = vmatpush3.msra.mxu0 %v1211_v12 }
 0x5eb   :  { %1682 = vmatprep.subr.mxu0 %v1226_v9  ;;  %v79_v9 = vld [vmem:[#allocation2 + $0x158] sm:$0xff] }
 0x5ec   :  { %1683 = vmatpush3.msra.mxu0 %v1210_v13  ;;  %v1220_v13 = vld [vmem:[%s2776_s4 + $0x80] sm:$0xff] }
 0x5ed   :  { %1684 = vmatprep.subr.mxu0 %v1225_v14  ;;  %v1204_v14 = vld [vmem:[%s2776_s4] sm:$0xff] }
 0x5ee   :  { %1685 = vmatpush3.msra.mxu0 %v1209_v15  ;;  %v1267_v15 = vld [vmem:[%s2776_s4 + $0x1f8] sm:$0xff] }
 0x5ef   :  { %1686 = vmatprep.subr.mxu0 %v1224_v16  ;;  %v1299_v16 = vld [vmem:[%s2776_s4 + $0x2f8] sm:$0xff] }
 0x5f0   :  { %1687 = vmatpush3.msra.mxu0 %v1208_v17  ;;  %v898_v17 = vpop.f32.mrf.mxu1 }
 0x5f1   :  { %1688 = vmatprep.subr.mxu0 %v1223_v18  ;;  %v751_v18 = vrot.slane %v734_v11, %v290_v6 }
 0x5f2   :  { %1689 = vmatpush3.msra.mxu0 %v1207_v19  ;;  %v743_v19 = vrot.slane %v734_v11, %v273_v50 }
 0x5f3   :  { %1690 = vmatprep.subr.mxu0 %v1222_v2  ;;  %v1259_v2 = vld [vmem:[%s2776_s4 + $0x1b8] sm:$0xff] }
 0x5f4   :  { %1691 = vmatpush3.msra.mxu0 %v1206_v55  ;;  %v1291_v55 = vld [vmem:[%s2776_s4 + $0x2b8] sm:$0xff] }
 0x5f5   :  { %1692 = vmatprep.subr.mxu0 %v1221_v7  ;;  %v1242_v7 = vld [vmem:[%s2776_s4 + $0x130] sm:$0xff] }
 0x5f6   :  { %1693 = vmatpush3.msra.mxu0 %v1205_v10  ;;  %v1257_v10 = vld [vmem:[%s2776_s4 + $0x1a8] sm:$0xff] }
 0x5f7   :  { %1694 = vmatprep.subr.mxu0 %v1220_v13  ;;  %v1289_v13 = vld [vmem:[%s2776_s4 + $0x2a8] sm:$0xff] }
 0x5f8   :  { %1695 = vmatpush3.msra.mxu0 %v1204_v14  ;;  %v1256_v14 = vld [vmem:[%s2776_s4 + $0x1a0] sm:$0xff] }
 0x5f9   :  { %1734 = vmatprep.subr.mxu0 %v1299_v16  ;;  %v1240_v16 = vld [vmem:[%s2776_s4 + $0x120] sm:$0xff] }
 0x659   :  { %v2508_v24 = vpop.f32.mrf.mxu0 }
 0x65a   :  { %1544 = vmatmul.mubr.msk.f32.vlgmr.msra.gmra.mxu1 %vm115_vm1, %v2508_v24 }
 0x65b   :  { %v1902_v23 = vpop.f32.mrf.mxu0  ;;  %1084 = vmatpush1.msra.mxu1 %v979_v20  ;;  %1119 = vmatprep.mubr.f32.mxu1 %v2005_v0  ;;  %v106_v0 = vld [vmem:[#allocation2 + $0x230] sm:$0xff]  ;;  %v747_v20 = vrot.slane %v734_v11, %v278_v51 }
 0x65c   :  { %1085 = vmatprep.subr.mxu1 %v976_v25  ;;  %v739_v25 = vrot.slane %v734_v11, %v113_v22  ;;  %v1283_v22 = vld [vmem:[%s2776_s4 + $0x278] sm:$0xff]  ;;  %v1293_v11 = vld [vmem:[%s2776_s4 + $0x2c8] sm:$0xff] }
 0x65d   :  { %1086 = vmatpush1.msra.mxu1 %v975_v26 }
 0x65e   :  { %1545 = vmatmul.mubr.msk.f32.vlgmr.msra.gmra.mxu1 %vm115_vm1, %v2508_v24  ;;  %1629 = vmatprep.subr.mxu1 %v110_v27 }
 0x65f   :  { %1630 = vmatpush3.msra.mxu1 %v94_v28  ;;  %v2568_v28 = vadd.f32 %v898_v17, %v747_v20  ;;  %v1288_v17 = vld [vmem:[%s2776_s4 + $0x2a0] sm:$0xff]  ;;  %v1239_v20 = vld [vmem:[%s2776_s4 + $0x118] sm:$0xff] }
 0x660   :  { %1631 = vmatprep.subr.mxu1 %v109_v29 }
 0x661   :  { %1632 = vmatpush3.msra.mxu1 %v93_v30 }
 0x662   :  { %1633 = vmatprep.subr.mxu1 %v108_v31 }
 0x663   :  { %1634 = vmatpush3.msra.mxu1 %v92_v32 }
 0x664   :  { %1635 = vmatprep.subr.mxu1 %v107_v33  ;;  %v1266_v33 = vld [vmem:[%s2776_s4 + $0x1f0] sm:$0xff] }
 0x665   :  { %1636 = vmatpush3.msra.mxu1 %v91_v34  ;;  %v1298_v34 = vld [vmem:[%s2776_s4 + $0x2f0] sm:$0xff] }
 0x666   :  { %1637 = vmatprep.subr.mxu1 %v106_v0 }
 0x667   :  { %1638 = vmatpush3.msra.mxu1 %v90_v35  ;;  %v1250_v35 = vld [vmem:[%s2776_s4 + $0x170] sm:$0xff] }
 0x668   :  { %1639 = vmatprep.subr.mxu1 %v105_v36 }
 0x669   :  { %1640 = vmatpush3.msra.mxu1 %v89_v37  ;;  %v1265_v37 = vld [vmem:[%s2776_s4 + $0x1e8] sm:$0xff] }
 0x66a   :  { %1641 = vmatprep.subr.mxu1 %v104_v38  ;;  %v1282_v38 = vld [vmem:[%s2776_s4 + $0x270] sm:$0xff] }
 0x66b   :  { %1642 = vmatpush3.msra.mxu1 %v88_v39  ;;  %v1249_v39 = vld [vmem:[%s2776_s4 + $0x168] sm:$0xff] }
 0x66c   :  { %1643 = vmatprep.subr.mxu1 %v103_v40  ;;  %v1297_v40 = vld [vmem:[%s2776_s4 + $0x2e8] sm:$0xff] }
 0x66d   :  { %1644 = vmatpush3.msra.mxu1 %v87_v41  ;;  %v1264_v41 = vld [vmem:[%s2776_s4 + $0x1e0] sm:$0xff] }
 0x66e   :  { %1645 = vmatprep.subr.mxu1 %v102_v42  ;;  %v1281_v42 = vld [vmem:[%s2776_s4 + $0x268] sm:$0xff] }
 0x66f   :  { %1646 = vmatpush3.msra.mxu1 %v86_v43  ;;  %v1248_v43 = vld [vmem:[%s2776_s4 + $0x160] sm:$0xff] }
 0x670   :  { %1647 = vmatprep.subr.mxu1 %v101_v44  ;;  %v1296_v44 = vld [vmem:[%s2776_s4 + $0x2e0] sm:$0xff] }
 0x671   :  { %1648 = vmatpush3.msra.mxu1 %v85_v5  ;;  %v1263_v5 = vld [vmem:[%s2776_s4 + $0x1d8] sm:$0xff] }
 0x672   :  { %1649 = vmatprep.subr.mxu1 %v100_v53  ;;  %v1280_v53 = vld [vmem:[%s2776_s4 + $0x260] sm:$0xff] }
 0x673   :  { %1650 = vmatpush3.msra.mxu1 %v84_v45  ;;  %v1247_v45 = vld [vmem:[%s2776_s4 + $0x158] sm:$0xff] }
 0x674   :  { %1651 = vmatprep.subr.mxu1 %v99_v46  ;;  %v1295_v46 = vld [vmem:[%s2776_s4 + $0x2d8] sm:$0xff] }
 0x675   :  { %1652 = vmatpush3.msra.mxu1 %v83_v47  ;;  %v1262_v47 = vld [vmem:[%s2776_s4 + $0x1d0] sm:$0xff] }
 0x676   :  { %1653 = vmatprep.subr.mxu1 %v98_v48  ;;  %v1279_v48 = vld [vmem:[%s2776_s4 + $0x258] sm:$0xff] }
 0x677   :  { %1654 = vmatpush3.msra.mxu1 %v82_v49  ;;  %v1246_v49 = vld [vmem:[%s2776_s4 + $0x150] sm:$0xff] }
 0x678   :  { %1655 = vmatprep.subr.mxu1 %v97_v52  ;;  %v1294_v52 = vld [vmem:[%s2776_s4 + $0x2d0] sm:$0xff] }
 0x679   :  { %v827_v59 = vpop.f32.mrf.mxu0  ;;  %1656 = vmatpush3.msra.mxu1 %v81_v1  ;;  %v1292_v1 = vld [vmem:[%s2776_s4 + $0x2c0] sm:$0xff] }
 0x67a   :  { %1657 = vmatprep.subr.mxu1 %v96_v4  ;;  %v2570_v29 = vadd.f32 %v827_v59, %v739_v25  ;;  %v1245_v59 = vld [vmem:[%s2776_s4 + $0x148] sm:$0xff]  ;;  %v1243_v4 = vld [vmem:[%s2776_s4 + $0x138] sm:$0xff]  ;;  %v1238_v25 = vld [vmem:[%s2776_s4 + $0x110] sm:$0xff] }
 0x67b   :  { %v829_v61 = vpop.f32.mrf.mxu0  ;;  %1658 = vmatpush3.msra.mxu1 %v80_v54  ;;  %v1275_v54 = vld [vmem:[%s2776_s4 + $0x238] sm:$0xff] }
 0x67c   :  { %1659 = vmatprep.subr.mxu1 %v95_v8  ;;  %v830_v27 = vadd.f32 %v829_v61, %v743_v19  ;;  %v1277_v61 = vld [vmem:[%s2776_s4 + $0x248] sm:$0xff]  ;;  %v1290_v8 = vld [vmem:[%s2776_s4 + $0x2b0] sm:$0xff]  ;;  %v1272_v19 = vld [vmem:[%s2776_s4 + $0x220] sm:$0xff] }
 0x67d   :  { %1660 = vmatpush3.msra.mxu1 %v79_v9  ;;  %v1241_v9 = vld [vmem:[%s2776_s4 + $0x128] sm:$0xff] }
 0x67e   :  { %1699 = vmatprep.subr.mxu1 %v1267_v15  ;;  %v1273_v15 = vld [vmem:[%s2776_s4 + $0x228] sm:$0xff] }
 0x699   :  { %v969_v62 = vpop.f32.mrf.mxu0 }
 0x69a   :  { %v2529_v63 = vadd.f32 %v969_v62, %v755_v60  ;;  %v1260_v60 = vld [vmem:[%s2776_s4 + $0x1c0] sm:$0xff] }
 0x69b   :  { %v1937_v3 = vpop.f32.mrf.mxu0  ;;  %v1244_v62 = vld [vmem:[%s2776_s4 + $0x140] sm:$0xff] }
 0x69c   :  { %v1515_v57 = vmul.f32 %v2529_v63, %v2508_v24  ;;  %v900_v24 = vpop.f32.mrf.mxu1  ;;  %v1276_v3 = vld [vmem:[%s2776_s4 + $0x240] sm:$0xff] }
 0x69d   :  { %v2566_v23 = vadd.f32 %v900_v24, %v751_v18  ;;  %v1255_v18 = vld [vmem:[%s2776_s4 + $0x198] sm:$0xff]  ;;  %v1254_v24 = vld [vmem:[%s2776_s4 + $0x190] sm:$0xff] }
 0x69e   :  { %v1516_v12 = vsel %vm115_vm1, %v1515_v57, 0.0  ;;  %v1258_v57 = vld [vmem:[%s2776_s4 + $0x1b0] sm:$0xff] }
 0x69f   :  { %1517 = vadd.xlane.f32.xlu1 %v1516_v12  ;;  %v1274_v12 = vld [vmem:[%s2776_s4 + $0x230] sm:$0xff] }
 0x71a   :  { %v1050_v26 = vpop.f32.mrf.mxu1 }
 0x71b   :  { %v1126_v50 = vmul.f32 %v1050_v26, %v2568_v28  ;;  %v1198_v51 = vmul.f32 %v1050_v26, %v2570_v29  ;;  %v1253_v26 = vld [vmem:[%s2776_s4 + $0x188] sm:$0xff] }
 0x71c   :  { %v1052_v30 = vpop.f32.mrf.mxu1 }
 0x71d   :  { %v1127_v6 = vmul.f32 %v1052_v30, %v2566_v23  ;;  %v1199_v31 = vmul.f32 %v1052_v30, %v830_v27  ;;  %v1252_v30 = vld [vmem:[%s2776_s4 + $0x180] sm:$0xff] }
 0x71e   :  { %v2575_v32 = vpop.f32.mrf.mxu1 }
 0x71f   :  { %1192 = vmatprep.mubr.f32.mxu1 %v1127_v6  ;;  %1369 = vmatprep.mubr.f32.mxu0 %v1199_v31  ;;  %v1236_v6 = vld [vmem:[%s2776_s4 + $0x100] sm:$0xff]  ;;  %v1200_v31 = vmul.f32 %v2575_v32, %v2570_v29  ;;  %v1270_v29 = vld [vmem:[%s2776_s4 + $0x210] sm:$0xff]  ;;  %v1285_v32 = vld [vmem:[%s2776_s4 + $0x288] sm:$0xff] }
 0x720   :  { %v1123_v0 = vpop.f32.mrf.mxu1  ;;  %1193 = vmatmul.mubr.f32.vlgmr.msra.gmra.mxu1 %v1126_v50  ;;  %1370 = vmatmul.mubr.f32.vlgmr.msra.gmra.mxu0 %v1198_v51  ;;  %v1287_v50 = vld [vmem:[%s2776_s4 + $0x298] sm:$0xff] }
 0x721   :  { %v1201_v36 = vmul.f32 %v1123_v0, %v830_v27  ;;  %1700 = vmatpush3.msra.mxu1 %v1251_v21  ;;  %1735 = vmatpush3.msra.mxu0 %v1283_v22  ;;  %v1237_v27 = vld [vmem:[%s2776_s4 + $0x108] sm:$0xff]  ;;  %v1271_v51 = vld [vmem:[%s2776_s4 + $0x218] sm:$0xff]  ;;  %v1286_v21 = vld [vmem:[%s2776_s4 + $0x290] sm:$0xff] }
 0x722   :  { %1701 = vmatprep.subr.mxu1 %v1266_v33  ;;  %1736 = vmatprep.subr.mxu0 %v1298_v34  ;;  %v1269_v22 = vld [vmem:[%s2776_s4 + $0x208] sm:$0xff]  ;;  %v1284_v33 = vld [vmem:[%s2776_s4 + $0x280] sm:$0xff] }
 0x723   :  { %1702 = vmatpush3.msra.mxu1 %v1250_v35  ;;  %1439 = vmatprep.mubr.f32.mxu1 %v1201_v36  ;;  %v1268_v34 = vld [vmem:[%s2776_s4 + $0x200] sm:$0xff]  ;;  %s2008_s4 = smov [#allocation5]  }
 0x724   :  { %1703 = vmatprep.subr.mxu1 %v1265_v37  ;;  %1737 = vmatpush3.msra.mxu0 %v1282_v38  ;;  %s1528_s11 = sshll.u32 %s2008_s4, 4  ;;  %s1529_s11 = int_to_ptr.vmem [resolvable:$true] %s1528_s11 }
 0x725   :  { %1704 = vmatpush3.msra.mxu1 %v1249_v39  ;;  %1738 = vmatprep.subr.mxu0 %v1297_v40  ;;  %s1978_s3 = scalar_lea.vmem %s1529_s11, 128  ;;  %p1983_p6 = scmp.lt.s32.totalorder %s1529_s11, %s1529_s11 }
 0x726   :  { %1705 = vmatprep.subr.mxu1 %v1264_v41  ;;  %1739 = vmatpush3.msra.mxu0 %v1281_v42  ;;  %v1302_v42 = vpop.permute.xlu0 %1301  ;;  %p1979_p5 = scmp.ne.s32.totalorder %s1529_s11, %s1978_s3  ;;  %p1984_p7 = scmp.lt.s32.totalorder %s1978_s3, %s1978_s3 }
 0x727   :  { %1706 = vmatpush3.msra.mxu1 %v1248_v43  ;;  %1740 = vmatprep.subr.mxu0 %v1296_v44 }
 0x728   :  { %1707 = vmatprep.subr.mxu1 %v1263_v5  ;;  %1741 = vmatpush3.msra.mxu0 %v1280_v53  ;;  %v1304_v5 = vmul.f32 %v1302_v42, %v2529_v63  ;;  %p1985_p8 = por %p1984_p7, %p1983_p6 }
 0x729   :  { %1708 = vmatpush3.msra.mxu1 %v1247_v45  ;;  %1742 = vmatprep.subr.mxu0 %v1295_v46 }
 0x72a   :  { %1709 = vmatprep.subr.mxu1 %v1262_v47  ;;  %1743 = vmatpush3.msra.mxu0 %v1279_v48  ;;  %p1986_p9 = pnand %p1985_p8, %p1979_p5 }
 0x72b   :  { %1710 = vmatpush3.msra.mxu1 %v1246_v49  ;;  %1744 = vmatprep.subr.mxu0 %v1294_v52 }
 0x72c   :  { %1711 = vmatprep.subr.mxu1 %v1261_v56  ;;  %1745 = vmatpush3.msra.mxu0 %v1278_v58 }
 0x72d   :  { %1712 = vmatpush3.msra.mxu1 %v1245_v59  ;;  %1746 = vmatprep.subr.mxu0 %v1293_v11 }
 0x72e   :  { %1713 = vmatprep.subr.mxu1 %v1260_v60  ;;  %1747 = vmatpush3.msra.mxu0 %v1277_v61 }
 0x72f   :  { %1714 = vmatpush3.msra.mxu1 %v1244_v62  ;;  %1748 = vmatprep.subr.mxu0 %v1292_v1 }
 0x730   :  { %1715 = vmatprep.subr.mxu1 %v1259_v2  ;;  %1749 = vmatpush3.msra.mxu0 %v1276_v3 }
 0x731   :  { %1716 = vmatpush3.msra.mxu1 %v1243_v4  ;;  %1750 = vmatprep.subr.mxu0 %v1291_v55 }
 0x732   :  { %1717 = vmatprep.subr.mxu1 %v1258_v57  ;;  %1751 = vmatpush3.msra.mxu0 %v1275_v54 }
 0x733   :  { %1718 = vmatpush3.msra.mxu1 %v1242_v7  ;;  %1752 = vmatprep.subr.mxu0 %v1290_v8 }
 0x734   :  { %1719 = vmatprep.subr.mxu1 %v1257_v10  ;;  %1753 = vmatpush3.msra.mxu0 %v1274_v12 }
 0x735   :  { %1720 = vmatpush3.msra.mxu1 %v1241_v9  ;;  %1754 = vmatprep.subr.mxu0 %v1289_v13 }
 0x736   :  { %1721 = vmatprep.subr.mxu1 %v1256_v14  ;;  %1755 = vmatpush3.msra.mxu0 %v1273_v15 }
 0x737   :  { %1722 = vmatpush3.msra.mxu1 %v1240_v16  ;;  %1756 = vmatprep.subr.mxu0 %v1288_v17 }
 0x738   :  { %1723 = vmatprep.subr.mxu1 %v1255_v18  ;;  %1757 = vmatpush3.msra.mxu0 %v1272_v19 }
 0x739   :  { %1724 = vmatpush3.msra.mxu1 %v1239_v20  ;;  %1758 = vmatprep.subr.mxu0 %v1287_v50 }
 0x73a   :  { %1725 = vmatprep.subr.mxu1 %v1254_v24  ;;  %1759 = vmatpush3.msra.mxu0 %v1271_v51 }
 0x73b   :  { %1726 = vmatpush3.msra.mxu1 %v1238_v25  ;;  %1760 = vmatprep.subr.mxu0 %v1286_v21 }
 0x73c   :  { %1727 = vmatprep.subr.mxu1 %v1253_v26  ;;  %1761 = vmatpush3.msra.mxu0 %v1270_v29 }
 0x73d   :  { %1728 = vmatpush3.msra.mxu1 %v1237_v27  ;;  %1762 = vmatprep.subr.mxu0 %v1285_v32 }
 0x73e   :  { %1729 = vmatprep.subr.mxu1 %v1252_v30  ;;  %1763 = vmatpush3.msra.mxu0 %v1269_v22 }
 0x73f   :  { %1730 = vmatpush3.msra.mxu1 %v1236_v6  ;;  %1764 = vmatprep.subr.mxu0 %v1284_v33 }
 0x740   :  { %1440 = vmatmul.mubr.f32.vlgmr.msra.gmra.mxu1 %v1200_v31  ;;  %1765 = vmatpush3.msra.mxu0 %v1268_v34 }
 0x7e0   :  { %v1661_v0 = vpop.f32.mrf.mxu1  ;;  %v1696_v39 = vpop.f32.mrf.mxu0 }
 0x7e2   :  { %v1662_v35 = vpop.f32.mrf.mxu1  ;;  %v1697_v41 = vpop.f32.mrf.mxu0 }
 0x7e3   :  { %v1663_v36 = vadd.f32 %v1662_v35, %v1661_v0  ;;  %v1698_v44 = vadd.f32 %v1697_v41, %v1696_v39 }
 0x7e5   :  { %v1202_v37 = vmul.f32 %v1663_v36, %v2568_v28  ;;  %v1203_v38 = vmul.f32 %v1663_v36, %v2566_v23  ;;  %v1372_v46 = vadd.f32 %v1698_v44, %v1304_v5  ;;  %v1518_v23 = vpop.xlane.xlu1 %1517 }
 0x7e7   :  { %1509 = vmatprep.mubr.f32.mxu0 %v1203_v38 }
 0x7e8   :  { %1510 = vmatmul.mubr.f32.vlgmr.msra.gmra.mxu0 %v1202_v37 }
 0x800   :  { %v1731_v40 = vpop.f32.mrf.mxu1 }
 0x802   :  { %v1732_v43 = vpop.f32.mrf.mxu1 }
 0x803   :  { %v1733_v53 = vadd.f32 %v1732_v43, %v1731_v40 }
 0x805   :  { %v1442_v48 = vadd.f32 %v1733_v53, %v1372_v46 }
 0x8a8   :  { %v1766_v45 = vpop.f32.mrf.mxu0 }
 0x8aa   :  { %v1767_v47 = vpop.f32.mrf.mxu0 }
 0x8ab   :  { %v1768_v49 = vadd.f32 %v1767_v47, %v1766_v45 }
 0x8ad   :  { %v1512_v28 = vadd.f32 %v1768_v49, %v1442_v48 }
 0x8af   :  { %1519 = vst.msk [vmem:[#allocation5] sm:$0xff] %vm115_vm1, %v1512_v28 }
 0x8b0   :  { %1521 = vst.msk [vmem:[#allocation5] sm:$0xff] %vm1520_vm3, %v1518_v23 }
 0x8b1   :  { %1989 = shalt.err (!%p1986_p9)
}
 0x8b2   :  { %1531 = dma.vmem_to_hbm [thread:$0]  %s1529_s11, 128, %s2777_s5, [#allocation4]  }
 0x8b3   :  { %2000 = dma.done.wait [#allocation4], 128  }
 0x8b4   :  { %2001 = vsyncadd [#allocation4], 4294967168 }
 0x8b5   :  { %1535 = vsyncpa [#allocation3], 1 }
 0x8b6   :  { %1536 = vsyncpa [#allocation4], 1 }

</bundles_post_ra>
